<compile_context>
chip_gen: v5e
topology: v5e:2x2
jax: 0.10.0
libtpu: 0.0.40
codegen_flags: <defaults>
</compile_context>

<pallas_src>
import functools

import numpy as np

import jax
import jax.numpy as jnp
from jax.experimental import pallas as pl
from jax.experimental.pallas import tpu as pltpu

NEG_SLOPE = 0.01  # nn.LeakyReLU default negative_slope
_LANE = 128


# ---------------------------------------------------------------------------
# VMEM budgets (generation-aware)
# ---------------------------------------------------------------------------
def _tpu_vmem_capacity_bytes():
    try:
        return int(pltpu.get_tpu_info().vmem_capacity_bytes)
    except Exception:
        return 64 * 2**20  # conservative default (v7x per-core physical VMEM)


def _vmem_limit_bytes():
    # ~48 MiB scoped on v7x (64 MiB physical), ~96 MiB on v5e/v6e (128 MiB physical).
    cap = _tpu_vmem_capacity_bytes()
    return int(min(cap * 3 // 4, 100 * 2**20))


def _const_spec(shape):
    """Full-array BlockSpec with a constant index map (grid-invariant operand).

    Requested single-buffered (pl.Buffered(1)) — constants gain nothing from double
    buffering and it halves their VMEM footprint.  Falls back to the default spec if
    this JAX build does not accept pipeline_mode.
    """
    idx = lambda *_: (0,) * len(shape)
    try:
        return pl.BlockSpec(shape, idx, pipeline_mode=pl.Buffered(1))
    except Exception:
        return pl.BlockSpec(shape, idx)


# ---------------------------------------------------------------------------
# Shared in-kernel helpers
# ---------------------------------------------------------------------------
def _head_activations(logits, cat_dim):
    """logits: (B, out_pad) f32.  col 0 -> sigmoid, cols [1, 1+cat_dim) -> softmax,
    remaining (cont + zero-padded) columns -> identity.  Exact divides (not on the
    critical slot); full-width masked ops, no in-kernel slicing."""
    col = jax.lax.broadcasted_iota(jnp.int32, logits.shape, 1)
    is_out = col == 0
    is_cat = (col >= 1) & (col < 1 + cat_dim)

    sig = 1.0 / (1.0 + jnp.exp(-logits))

    cat_l = jnp.where(is_cat, logits, -1e30)
    m = jnp.max(cat_l, axis=-1, keepdims=True)
    e = jnp.where(is_cat, jnp.exp(cat_l - m), 0.0)
    sm = e / jnp.sum(e, axis=-1, keepdims=True)

    return jnp.where(is_out, sig, jnp.where(is_cat, sm, logits))


# ---------------------------------------------------------------------------
# Kernel 1 (primary): fully fused forward — matmul chain + heads, one grid step per
# batch tile.  Intermediate activations never leave VMEM/vregs.
# ---------------------------------------------------------------------------
def _fused_forward_kernel(x_ref, w1_ref, w2_ref, w3_ref, w4_ref, wh_ref,
                          b1_ref, b2_ref, b3_ref, b4_ref, bh_ref, res_ref, *, cat_dim):
    h = x_ref[...]                                                # (Bt, D0) bf16 (NCHW flat)
    for w_ref, b_ref in ((w1_ref, b1_ref), (w2_ref, b2_ref),
                         (w3_ref, b3_ref), (w4_ref, b4_ref)):
        z = jnp.dot(h, w_ref[...], preferred_element_type=jnp.float32) + b_ref[...]
        h = jnp.where(z >= 0.0, z, NEG_SLOPE * z).astype(jnp.bfloat16)
    logits = jnp.dot(h, wh_ref[...], preferred_element_type=jnp.float32) + bh_ref[...]
    res_ref[...] = _head_activations(logits, cat_dim)


# ---------------------------------------------------------------------------
# Kernel 2 (fallback): im2col-matmul + f32 bias + leaky_relu, gridded over M.
# ---------------------------------------------------------------------------
def _conv_matmul_bias_lrelu_kernel(p_ref, w_ref, b_ref, o_ref):
    z = jnp.dot(p_ref[...], w_ref[...], preferred_element_type=jnp.float32) + b_ref[...]
    o_ref[...] = jnp.where(z >= 0.0, z, NEG_SLOPE * z).astype(o_ref.dtype)


# Kernel 3 (fallback): fused heads (single matmul + masked activations, lane-dense out).
def _heads_kernel(f_ref, wh_ref, bh_ref, res_ref, *, cat_dim):
    logits = jnp.dot(f_ref[...], wh_ref[...], preferred_element_type=jnp.float32) + bh_ref[...]
    res_ref[...] = _head_activations(logits, cat_dim)


# ---------------------------------------------------------------------------
# Tile selection
# ---------------------------------------------------------------------------
def _pick_batch_tile(n):
    # Splitting the batch grid only pays when each TensorCore's share amortizes its own
    # fetch of the multi-MiB resident weights; otherwise run a single step on one core.
    if n < 256:
        return n
    return 128  # multiple of 16 (bf16 sublane pack); >=2 steps for megacore sharding


def _pick_tile_m(m, k_cols, cout, budget_bytes):
    if m <= 512:
        return m
    # double-buffered bf16 patch rows + bf16 out rows per tile row
    per_row = 2 * 2 * k_cols + 2 * 2 * cout
    tm = 2048
    while tm > 16 and tm * per_row > budget_bytes:
        tm //= 2
    return max(16, tm)


# ---------------------------------------------------------------------------
# Parameter preparation (host-side, runs once)
# ---------------------------------------------------------------------------
def _build_conv_dense(w_oihw, h_in, w_in, *, nchw_rows=False):
    """Lower a 3x3 / stride-2 / pad-1 conv to a dense (Din, Dout) matrix acting on
    flattened features (columns in NHWC-flatten order).  If nchw_rows, the ROW order is
    NCHW-flatten so the matrix consumes the raw NCHW-flattened input (no relayout)."""
    w = np.asarray(w_oihw, np.float32)
    cout, cin, kh_dim, kw_dim = w.shape
    ho, wo = h_in // 2, w_in // 2
    din, dout = h_in * w_in * cin, ho * wo * cout
    wd = np.zeros((din, dout), np.float32)
    for oh in range(ho):
        for ow in range(wo):
            ob = (oh * wo + ow) * cout
            for kh in range(kh_dim):
                ih = 2 * oh + kh - 1
                if ih < 0 or ih >= h_in:
                    continue
                for kw in range(kw_dim):
                    iw = 2 * ow + kw - 1
                    if iw < 0 or iw >= w_in:
                        continue
                    blk = w[:, :, kh, kw].T                      # (Cin, Cout)
                    if nchw_rows:
                        rows = np.arange(cin) * (h_in * w_in) + ih * w_in + iw
                        wd[rows, ob:ob + cout] = blk
                    else:
                        ib = (ih * w_in + iw) * cin
                        wd[ib:ib + cin, ob:ob + cout] = blk
    return wd


def _tile_bias(b, h_out, w_out):
    """Conv bias broadcast over the NHWC-flattened output columns: (1, Ho*Wo*Cout) f32."""
    return np.tile(np.asarray(b, np.float32), h_out * w_out).reshape(1, -1)


def _build_heads(out_w, out_b, cat_w, cat_b, cont_w, cont_b, ho, wo, c4):
    """Concatenate the three PyTorch Linear heads into one (F, out_pad) matrix acting on
    NHWC-flattened features (the NCHW .view() reorder is folded in) plus an f32 bias row.
    Columns are zero-padded to a multiple of 128 so the kernel output is lane-dense."""
    w_pt = np.concatenate([np.asarray(out_w), np.asarray(cat_w), np.asarray(cont_w)],
                          axis=0).astype(np.float32)                     # (1+cat+cont, F)
    b_all = np.concatenate([np.asarray(out_b), np.asarray(cat_b), np.asarray(cont_b)],
                           axis=0).astype(np.float32)
    n_out = w_pt.shape[0]
    feat = ho * wo * c4
    assert w_pt.shape[1] == feat
    # NHWC-flatten (kernel) index -> NCHW-flatten (PyTorch .view) index
    perm = (np.arange(c4)[None, :] * (ho * wo) + np.arange(ho * wo)[:, None]).reshape(-1)
    w_k = w_pt[:, perm].T                                                # (F, n_out)
    out_pad = ((n_out + _LANE - 1) // _LANE) * _LANE
    wpad = np.zeros((feat, out_pad), np.float32)
    wpad[:, :n_out] = w_k
    bpad = np.zeros((1, out_pad), np.float32)
    bpad[0, :n_out] = b_all
    return wpad, bpad


def init_params(key, input_channels, conv_layers, height, width, cat_dim, cont_dim):
    """Synthetic parameters in PyTorch layout (conv: (Cout,Cin,3,3); Linear: (out,in))."""
    c1, c2, c4 = conv_layers, conv_layers * 2, conv_layers * 4
    feat_dim = (height // 16) * (width // 16) * c4
    ks = jax.random.split(key, 14)

    def w(k, shape, fan_in):
        return jax.random.normal(k, shape, jnp.float32) / np.sqrt(fan_in)

    return {
        "conv1_w": w(ks[0], (c1, input_channels, 3, 3), 9 * input_channels),
        "conv1_b": w(ks[1], (c1,), 9 * input_channels),
        "conv2_w": w(ks[2], (c2, c1, 3, 3), 9 * c1),
        "conv2_b": w(ks[3], (c2,), 9 * c1),
        "conv3_w": w(ks[4], (c2, c2, 3, 3), 9 * c2),
        "conv3_b": w(ks[5], (c2,), 9 * c2),
        "conv4_w": w(ks[6], (c4, c2, 3, 3), 9 * c2),
        "conv4_b": w(ks[7], (c4,), 9 * c2),
        "out_w": w(ks[8], (1, feat_dim), feat_dim),
        "out_b": w(ks[9], (1,), feat_dim),
        "cat_w": w(ks[10], (cat_dim, feat_dim), feat_dim),
        "cat_b": w(ks[11], (cat_dim,), feat_dim),
        "cont_w": w(ks[12], (cont_dim, feat_dim), feat_dim),
        "cont_b": w(ks[13], (cont_dim,), feat_dim),
    }


def prepare_params(params, *, input_channels, conv_layers, height, width, cat_dim, cont_dim):
    if height % 16 or width % 16:
        # 4 stride-2 convs + the flatten require H, W divisible by 16 (as in the module).
        raise ValueError("height and width must be divisible by 16")
    c1, c2, c4 = conv_layers, conv_layers * 2, conv_layers * 4
    layer_dims = [(input_channels, c1, height, width),
                  (c1, c2, height // 2, width // 2),
                  (c2, c2, height // 4, width // 4),
                  (c2, c4, height // 8, width // 8)]
    ho, wo = height // 16, width // 16

    head_w_np, head_b_np = _build_heads(params["out_w"], params["out_b"],
                                        params["cat_w"], params["cat_b"],
                                        params["cont_w"], params["cont_b"], ho, wo, c4)
    head_w = jnp.asarray(head_w_np, jnp.bfloat16)
    head_b = jnp.asarray(head_b_np, jnp.float32)

    general = {f"conv{i}_{s}": params[f"conv{i}_{s}"] for i in (1, 2, 3, 4) for s in ("w", "b")}
    general["head_w"] = head_w
    general["head_b"] = head_b

    # Fused path only when the (single-buffered) dense layer matrices + head + biases fit
    # in roughly half the scoped VMEM, leaving the rest for activation tiles & buffers.
    vmem_limit = _vmem_limit_bytes()
    dense_bytes = sum(hi * wi * ci * (hi // 2) * (wi // 2) * co * 2
                      for (ci, co, hi, wi) in layer_dims)
    dense_bytes += head_w.size * 2 + head_b.size * 4
    dense_bytes += sum((hi // 2) * (wi // 2) * co * 4 for (ci, co, hi, wi) in layer_dims)
    fused = None
    if dense_bytes <= vmem_limit // 2:
        mats, biases = [], []
        for i, (ci, co, hi, wi) in enumerate(layer_dims, start=1):
            mats.append(jnp.asarray(
                _build_conv_dense(params[f"conv{i}_w"], hi, wi, nchw_rows=(i == 1)),
                jnp.bfloat16))
            biases.append(jnp.asarray(_tile_bias(params[f"conv{i}_b"], hi // 2, wi // 2),
                                      jnp.float32))
        fused = {"w1": mats[0], "w2": mats[1], "w3": mats[2], "w4": mats[3], "wh": head_w,
                 "b1": biases[0], "b2": biases[1], "b3": biases[2], "b4": biases[3],
                 "bh": head_b}
    return {"fused": fused, "general": general}


# ---------------------------------------------------------------------------
# Forward — primary fused path
# ---------------------------------------------------------------------------
@functools.partial(jax.jit, static_argnames=("cat_dim", "cont_dim"))
def forward_fused(x_nchw, fparams, *, cat_dim, cont_dim):
    n = x_nchw.shape[0]
    # NCHW flatten is a free reshape; the NCHW->NHWC permutation is folded into w1's rows,
    # so there is NO pre-kernel relayout.  Cast to bf16 before anything else.
    x = x_nchw.astype(jnp.bfloat16).reshape(n, -1)
    d0 = x.shape[1]

    w1, w2, w3, w4, wh = (fparams[k] for k in ("w1", "w2", "w3", "w4", "wh"))
    b1, b2, b3, b4, bh = (fparams[k] for k in ("b1", "b2", "b3", "b4", "bh"))
    out_pad = wh.shape[1]
    bt = _pick_batch_tile(n)

    const_specs = [_const_spec(a.shape) for a in (w1, w2, w3, w4, wh, b1, b2, b3, b4, bh)]
    res = pl.pallas_call(
        functools.partial(_fused_forward_kernel, cat_dim=cat_dim),
        out_shape=jax.ShapeDtypeStruct((n, out_pad), jnp.float32),
        grid=(pl.cdiv(n, bt),),
        in_specs=[pl.BlockSpec((bt, d0), lambda b: (b, 0))] + const_specs,
        out_specs=pl.BlockSpec((bt, out_pad), lambda b: (b, 0)),
        compiler_params=pltpu.CompilerParams(
            dimension_semantics=("parallel",),
            vmem_limit_bytes=_vmem_limit_bytes()),
    )(x, w1, w2, w3, w4, wh, b1, b2, b3, b4, bh)

    return (res[:, :1],
            res[:, 1:1 + cat_dim],
            res[:, 1 + cat_dim:1 + cat_dim + cont_dim])


# ---------------------------------------------------------------------------
# Forward — general (tiled im2col) fallback path for large spatial sizes
# ---------------------------------------------------------------------------
def _conv2d_s2_p1_lrelu_tiled(x_nhwc, w_oihw, b, vmem_limit):
    n, h, w_dim, cin = x_nhwc.shape
    cout = w_oihw.shape[0]
    ho, wo = h // 2, w_dim // 2

    # im2col patch extraction (XLA, bf16).  See TODO(synk) at top about moving it in-kernel.
    xp = jnp.pad(x_nhwc, ((0, 0), (1, 1), (1, 1), (0, 0)))
    cols = [xp[:, kh:kh + 2 * ho:2, kw:kw + 2 * wo:2, :] for kh in range(3) for kw in range(3)]
    patches = jnp.concatenate(cols, axis=-1).reshape(n * ho * wo, 9 * cin)

    # (Cout,Cin,3,3) -> (3,3,Cin,Cout) -> (9*Cin,Cout) bf16; bias as a separate f32 row.
    wmat = jnp.transpose(w_oihw, (2, 3, 1, 0)).reshape(9 * cin, cout).astype(jnp.bfloat16)
    bvec = b.reshape(1, cout).astype(jnp.float32)

    m, k = patches.shape
    tm = _pick_tile_m(m, k, cout, budget_bytes=vmem_limit // 2)
    out = pl.pallas_call(
        _conv_matmul_bias_lrelu_kernel,
        out_shape=jax.ShapeDtypeStruct((m, cout), jnp.bfloat16),
        grid=(pl.cdiv(m, tm),),
        in_specs=[pl.BlockSpec((tm, k), lambda i: (i, 0)),
                  _const_spec(wmat.shape),
                  _const_spec(bvec.shape)],
        out_specs=pl.BlockSpec((tm, cout), lambda i: (i, 0)),
        compiler_params=pltpu.CompilerParams(
            dimension_semantics=("parallel",), vmem_limit_bytes=vmem_limit),
    )(patches, wmat, bvec)
    return out.reshape(n, ho, wo, cout)


@functools.partial(jax.jit, static_argnames=("cat_dim", "cont_dim"))
def forward_general(x_nchw, gparams, *, cat_dim, cont_dim):
    vmem_limit = _vmem_limit_bytes()
    # bf16 BEFORE the NHWC relayout / im2col: halves HBM bytes of the memory-bound stage.
    x = jnp.transpose(x_nchw.astype(jnp.bfloat16), (0, 2, 3, 1))
    for i in (1, 2, 3, 4):
        x = _conv2d_s2_p1_lrelu_tiled(x, gparams[f"conv{i}_w"], gparams[f"conv{i}_b"],
                                      vmem_limit)

    n = x.shape[0]
    feat = x.reshape(n, -1)   # NHWC flatten (NCHW reorder folded into the head matrix)

    wh, bh = gparams["head_w"], gparams["head_b"]
    out_pad = wh.shape[1]
    bt = _pick_batch_tile(n)
    res = pl.pallas_call(
        functools.partial(_heads_kernel, cat_dim=cat_dim),
        out_shape=jax.ShapeDtypeStruct((n, out_pad), jnp.float32),
        grid=(pl.cdiv(n, bt),),
        in_specs=[pl.BlockSpec((bt, feat.shape[1]), lambda i: (i, 0)),
                  _const_spec(wh.shape),
                  _const_spec(bh.shape)],
        out_specs=pl.BlockSpec((bt, out_pad), lambda i: (i, 0)),
        compiler_params=pltpu.CompilerParams(
            dimension_semantics=("parallel",), vmem_limit_bytes=vmem_limit),
    )(feat, wh, bh)
    return (res[:, :1],
            res[:, 1:1 + cat_dim],
            res[:, 1 + cat_dim:1 + cat_dim + cont_dim])


def discriminator_recognizer_forward(x_nchw, prepared, *, cat_dim, cont_dim):
    if prepared["fused"] is not None:
        return forward_fused(x_nchw, prepared["fused"], cat_dim=cat_dim, cont_dim=cont_dim)
    return forward_general(x_nchw, prepared["general"], cat_dim=cat_dim, cont_dim=cont_dim)


# ---------------------------------------------------------------------------
# Pure-JAX (f32) reference of the PyTorch forward, for verification only.
# ---------------------------------------------------------------------------
@jax.jit
def reference_forward(x_nchw, params):
    def conv(y, w, b):
        y = jax.lax.conv_general_dilated(y, w, (2, 2), ((1, 1), (1, 1)),
                                         dimension_numbers=("NCHW", "OIHW", "NCHW"))
        y = y + b.reshape(1, -1, 1, 1)
        return jnp.where(y >= 0.0, y, NEG_SLOPE * y)

    y = x_nchw.astype(jnp.float32)
    y = conv(y, params["conv1_w"], params["conv1_b"])
    y = conv(y, params["conv2_w"], params["conv2_b"])
    y = conv(y, params["conv3_w"], params["conv3_b"])
    y = conv(y, params["conv4_w"], params["conv4_b"])
    feat = y.reshape(y.shape[0], -1)                       # NCHW flatten (PyTorch .view)
    out = jax.nn.sigmoid(feat @ params["out_w"].T + params["out_b"])
    cat = jax.nn.softmax(feat @ params["cat_w"].T + params["cat_b"], axis=-1)
    cont = feat @ params["cont_w"].T + params["cont_b"]
    return out, cat, cont


# ---------------------------------------------------------------------------
if __name__ == "__main__":
    batch = 2
    input_channels = 4
    conv_layers = 8
    height = width = 16          # H//16 = W//16 = 1  ->  feat_dim = 32
    cat_dim = 10
    cont_dim = 2
    # (pool_kernel_size, conv_kernel_size=3, hidden are unused in forward.)

    key = jax.random.PRNGKey(0)
    k_in, k_p = jax.random.split(key)
    x = jax.random.normal(k_in, (batch, input_channels, height, width), jnp.float32)
    params = init_params(k_p, input_channels, conv_layers, height, width, cat_dim, cont_dim)
    prepared = prepare_params(params, input_channels=input_channels, conv_layers=conv_layers,
                              height=height, width=width, cat_dim=cat_dim, cont_dim=cont_dim)

    # Primary (fused single-kernel) path.
    out_f, cat_f, cont_f = discriminator_recognizer_forward(
        x, prepared, cat_dim=cat_dim, cont_dim=cont_dim)
    jax.block_until_ready((out_f, cat_f, cont_f))

    # General (tiled im2col) fallback path, exercised explicitly as a cross-check.
    out_g, cat_g, cont_g = forward_general(
        x, prepared["general"], cat_dim=cat_dim, cont_dim=cont_dim)
    jax.block_until_ready((out_g, cat_g, cont_g))

    # Reference (f32, plain XLA).
    out_r, cat_r, cont_r = reference_forward(x, params)
    jax.block_until_ready((out_r, cat_r, cont_r))

    assert out_f.shape == (batch, 1)
    assert cat_f.shape == (batch, cat_dim)
    assert cont_f.shape == (batch, cont_dim)
    for got, ref in ((out_f, out_r), (cat_f, cat_r), (cont_f, cont_r),
                     (out_g, out_r), (cat_g, cat_r), (cont_g, cont_r)):
        assert bool(jnp.allclose(got, ref, atol=5e-2, rtol=5e-2)), (got, ref)
    # sigmoid in (0, 1]; softmax rows sum to 1 (exact division now)
    assert bool(jnp.all((out_f > 0.0) & (out_f <= 1.0)))
    assert bool(jnp.allclose(jnp.sum(cat_f, axis=-1), 1.0, atol=1e-3))

    print("KERNEL_OK")
</pallas_src>

<mosaic_0001>
module attributes {stable_mosaic.version = 11 : i64} {
  func.func @_fused_forward_kernel(%arg0: i32, %arg1: memref<2x1024xbf16, #tpu.memory_space<vmem>>, %arg2: memref<1024x512xbf16, #tpu.memory_space<vmem>>, %arg3: memref<512x256xbf16, #tpu.memory_space<vmem>>, %arg4: memref<256x64xbf16, #tpu.memory_space<vmem>>, %arg5: memref<64x32xbf16, #tpu.memory_space<vmem>>, %arg6: memref<32x128xbf16, #tpu.memory_space<vmem>>, %arg7: memref<1x512xf32, #tpu.memory_space<vmem>>, %arg8: memref<1x256xf32, #tpu.memory_space<vmem>>, %arg9: memref<1x64xf32, #tpu.memory_space<vmem>>, %arg10: memref<1x32xf32, #tpu.memory_space<vmem>>, %arg11: memref<1x128xf32, #tpu.memory_space<vmem>>, %arg12: memref<2x128xf32, #tpu.memory_space<vmem>>) attributes {dimension_semantics = [#tpu.dimension_semantics<parallel>], iteration_bounds = array<i64: 1>, scalar_prefetch = 0 : i64, scratch_operands = 0 : i64, tpu.core_type = #tpu.core_type<tc>, window_params = [{transform_indices = @transform_0, window_bounds = array<i64: 2, 1024>}, {pipeline_mode = #tpu.pipeline_mode<synchronous>, transform_indices = @transform_1, window_bounds = array<i64: 1024, 512>}, {pipeline_mode = #tpu.pipeline_mode<synchronous>, transform_indices = @transform_2, window_bounds = array<i64: 512, 256>}, {pipeline_mode = #tpu.pipeline_mode<synchronous>, transform_indices = @transform_3, window_bounds = array<i64: 256, 64>}, {pipeline_mode = #tpu.pipeline_mode<synchronous>, transform_indices = @transform_4, window_bounds = array<i64: 64, 32>}, {pipeline_mode = #tpu.pipeline_mode<synchronous>, transform_indices = @transform_5, window_bounds = array<i64: 32, 128>}, {pipeline_mode = #tpu.pipeline_mode<synchronous>, transform_indices = @transform_6, window_bounds = array<i64: 1, 512>}, {pipeline_mode = #tpu.pipeline_mode<synchronous>, transform_indices = @transform_7, window_bounds = array<i64: 1, 256>}, {pipeline_mode = #tpu.pipeline_mode<synchronous>, transform_indices = @transform_8, window_bounds = array<i64: 1, 64>}, {pipeline_mode = #tpu.pipeline_mode<synchronous>, transform_indices = @transform_9, window_bounds = array<i64: 1, 32>}, {pipeline_mode = #tpu.pipeline_mode<synchronous>, transform_indices = @transform_10, window_bounds = array<i64: 1, 128>}, {transform_indices = @transform_11, window_bounds = array<i64: 2, 128>}]} {
    %c0 = arith.constant 0 : index
    %c0_0 = arith.constant 0 : index
    %0 = vector.load %arg1[%c0, %c0_0] : memref<2x1024xbf16, #tpu.memory_space<vmem>>, vector<2x1024xbf16>
    %c0_1 = arith.constant 0 : index
    %c0_2 = arith.constant 0 : index
    %1 = vector.load %arg2[%c0_1, %c0_2] : memref<1024x512xbf16, #tpu.memory_space<vmem>>, vector<1024x512xbf16>
    %cst = arith.constant dense<0.000000e+00> : vector<2x512xf32>
    %2 = tpu.matmul %0, %1, %cst {dimension_numbers = #tpu.dot_dimension_numbers<[1], [0], [0], [1], [0, 0, 1, 1], [], []>} : vector<2x1024xbf16>, vector<1024x512xbf16>, vector<2x512xf32> -> vector<2x512xf32>
    %c0_3 = arith.constant 0 : index
    %c0_4 = arith.constant 0 : index
    %3 = vector.load %arg7[%c0_3, %c0_4] : memref<1x512xf32, #tpu.memory_space<vmem>>, vector<1x512xf32>
    %4 = vector.broadcast %3 : vector<1x512xf32> to vector<2x512xf32>
    %5 = arith.addf %2, %4 : vector<2x512xf32>
    %cst_5 = arith.constant 0.000000e+00 : f32
    %6 = vector.broadcast %cst_5 : f32 to vector<2x512xf32>
    %7 = arith.cmpf oge, %5, %6 : vector<2x512xf32>
    %cst_6 = arith.constant 0.00999999977 : f32
    %8 = vector.broadcast %cst_6 : f32 to vector<2x512xf32>
    %9 = arith.mulf %8, %5 : vector<2x512xf32>
    %10 = arith.select %7, %5, %9 : vector<2x512xi1>, vector<2x512xf32>
    %11 = arith.truncf %10 : vector<2x512xf32> to vector<2x512xbf16>
    %c0_7 = arith.constant 0 : index
    %c0_8 = arith.constant 0 : index
    %12 = vector.load %arg3[%c0_7, %c0_8] : memref<512x256xbf16, #tpu.memory_space<vmem>>, vector<512x256xbf16>
    %cst_9 = arith.constant dense<0.000000e+00> : vector<2x256xf32>
    %13 = tpu.matmul %11, %12, %cst_9 {dimension_numbers = #tpu.dot_dimension_numbers<[1], [0], [0], [1], [0, 0, 1, 1], [], []>} : vector<2x512xbf16>, vector<512x256xbf16>, vector<2x256xf32> -> vector<2x256xf32>
    %c0_10 = arith.constant 0 : index
    %c0_11 = arith.constant 0 : index
    %14 = vector.load %arg8[%c0_10, %c0_11] : memref<1x256xf32, #tpu.memory_space<vmem>>, vector<1x256xf32>
    %15 = vector.broadcast %14 : vector<1x256xf32> to vector<2x256xf32>
    %16 = arith.addf %13, %15 : vector<2x256xf32>
    %cst_12 = arith.constant 0.000000e+00 : f32
    %17 = vector.broadcast %cst_12 : f32 to vector<2x256xf32>
    %18 = arith.cmpf oge, %16, %17 : vector<2x256xf32>
    %cst_13 = arith.constant 0.00999999977 : f32
    %19 = vector.broadcast %cst_13 : f32 to vector<2x256xf32>
    %20 = arith.mulf %19, %16 : vector<2x256xf32>
    %21 = arith.select %18, %16, %20 : vector<2x256xi1>, vector<2x256xf32>
    %22 = arith.truncf %21 : vector<2x256xf32> to vector<2x256xbf16>
    %c0_14 = arith.constant 0 : index
    %c0_15 = arith.constant 0 : index
    %23 = vector.load %arg4[%c0_14, %c0_15] : memref<256x64xbf16, #tpu.memory_space<vmem>>, vector<256x64xbf16>
    %cst_16 = arith.constant dense<0.000000e+00> : vector<2x64xf32>
    %24 = tpu.matmul %22, %23, %cst_16 {dimension_numbers = #tpu.dot_dimension_numbers<[1], [0], [0], [1], [0, 0, 1, 1], [], []>} : vector<2x256xbf16>, vector<256x64xbf16>, vector<2x64xf32> -> vector<2x64xf32>
    %c0_17 = arith.constant 0 : index
    %c0_18 = arith.constant 0 : index
    %25 = vector.load %arg9[%c0_17, %c0_18] : memref<1x64xf32, #tpu.memory_space<vmem>>, vector<1x64xf32>
    %26 = vector.broadcast %25 : vector<1x64xf32> to vector<2x64xf32>
    %27 = arith.addf %24, %26 : vector<2x64xf32>
    %cst_19 = arith.constant 0.000000e+00 : f32
    %28 = vector.broadcast %cst_19 : f32 to vector<2x64xf32>
    %29 = arith.cmpf oge, %27, %28 : vector<2x64xf32>
    %cst_20 = arith.constant 0.00999999977 : f32
    %30 = vector.broadcast %cst_20 : f32 to vector<2x64xf32>
    %31 = arith.mulf %30, %27 : vector<2x64xf32>
    %32 = arith.select %29, %27, %31 : vector<2x64xi1>, vector<2x64xf32>
    %33 = arith.truncf %32 : vector<2x64xf32> to vector<2x64xbf16>
    %c0_21 = arith.constant 0 : index
    %c0_22 = arith.constant 0 : index
    %34 = vector.load %arg5[%c0_21, %c0_22] : memref<64x32xbf16, #tpu.memory_space<vmem>>, vector<64x32xbf16>
    %cst_23 = arith.constant dense<0.000000e+00> : vector<2x32xf32>
    %35 = tpu.matmul %33, %34, %cst_23 {dimension_numbers = #tpu.dot_dimension_numbers<[1], [0], [0], [1], [0, 0, 1, 1], [], []>} : vector<2x64xbf16>, vector<64x32xbf16>, vector<2x32xf32> -> vector<2x32xf32>
    %c0_24 = arith.constant 0 : index
    %c0_25 = arith.constant 0 : index
    %36 = vector.load %arg10[%c0_24, %c0_25] : memref<1x32xf32, #tpu.memory_space<vmem>>, vector<1x32xf32>
    %37 = vector.broadcast %36 : vector<1x32xf32> to vector<2x32xf32>
    %38 = arith.addf %35, %37 : vector<2x32xf32>
    %cst_26 = arith.constant 0.000000e+00 : f32
    %39 = vector.broadcast %cst_26 : f32 to vector<2x32xf32>
    %40 = arith.cmpf oge, %38, %39 : vector<2x32xf32>
    %cst_27 = arith.constant 0.00999999977 : f32
    %41 = vector.broadcast %cst_27 : f32 to vector<2x32xf32>
    %42 = arith.mulf %41, %38 : vector<2x32xf32>
    %43 = arith.select %40, %38, %42 : vector<2x32xi1>, vector<2x32xf32>
    %44 = arith.truncf %43 : vector<2x32xf32> to vector<2x32xbf16>
    %c0_28 = arith.constant 0 : index
    %c0_29 = arith.constant 0 : index
    %45 = vector.load %arg6[%c0_28, %c0_29] : memref<32x128xbf16, #tpu.memory_space<vmem>>, vector<32x128xbf16>
    %cst_30 = arith.constant dense<0.000000e+00> : vector<2x128xf32>
    %46 = tpu.matmul %44, %45, %cst_30 {dimension_numbers = #tpu.dot_dimension_numbers<[1], [0], [0], [1], [0, 0, 1, 1], [], []>} : vector<2x32xbf16>, vector<32x128xbf16>, vector<2x128xf32> -> vector<2x128xf32>
    %c0_31 = arith.constant 0 : index
    %c0_32 = arith.constant 0 : index
    %47 = vector.load %arg11[%c0_31, %c0_32] : memref<1x128xf32, #tpu.memory_space<vmem>>, vector<1x128xf32>
    %48 = vector.broadcast %47 : vector<1x128xf32> to vector<2x128xf32>
    %49 = arith.addf %46, %48 : vector<2x128xf32>
    %50 = tpu.iota {dimensions = array<i32: 1>} : vector<2x128xi32>
    %c0_i32 = arith.constant 0 : i32
    %51 = vector.broadcast %c0_i32 : i32 to vector<2x128xi32>
    %52 = arith.cmpi eq, %50, %51 : vector<2x128xi32>
    %c1_i32 = arith.constant 1 : i32
    %53 = vector.broadcast %c1_i32 : i32 to vector<2x128xi32>
    %54 = arith.cmpi sge, %50, %53 : vector<2x128xi32>
    %c11_i32 = arith.constant 11 : i32
    %55 = vector.broadcast %c11_i32 : i32 to vector<2x128xi32>
    %56 = arith.cmpi slt, %50, %55 : vector<2x128xi32>
    %57 = arith.andi %54, %56 : vector<2x128xi1>
    %cst_33 = arith.constant 0.000000e+00 : f32
    %58 = vector.broadcast %cst_33 : f32 to vector<2x128xf32>
    %59 = arith.subf %58, %49 : vector<2x128xf32>
    %60 = math.exp %59 : vector<2x128xf32>
    %cst_34 = arith.constant 1.000000e+00 : f32
    %61 = vector.broadcast %cst_34 : f32 to vector<2x128xf32>
    %62 = arith.addf %61, %60 : vector<2x128xf32>
    %cst_35 = arith.constant 1.000000e+00 : f32
    %63 = vector.broadcast %cst_35 : f32 to vector<2x128xf32>
    %64 = arith.divf %63, %62 : vector<2x128xf32>
    %cst_36 = arith.constant -1.000000e+30 : f32
    %65 = vector.broadcast %cst_36 : f32 to vector<2x128xf32>
    %66 = arith.select %57, %49, %65 : vector<2x128xi1>, vector<2x128xf32>
    %cst_37 = arith.constant dense<0xFF800000> : vector<2xf32>
    %67 = vector.multi_reduction <maximumf>, %66, %cst_37 [1] : vector<2x128xf32> to vector<2xf32>
    %68 = vector.shape_cast %67 : vector<2xf32> to vector<2x1xf32>
    %69 = vector.broadcast %68 : vector<2x1xf32> to vector<2x128xf32>
    %70 = arith.subf %66, %69 : vector<2x128xf32>
    %71 = math.exp %70 : vector<2x128xf32>
    %cst_38 = arith.constant 0.000000e+00 : f32
    %72 = vector.broadcast %cst_38 : f32 to vector<2x128xf32>
    %73 = arith.select %57, %71, %72 : vector<2x128xi1>, vector<2x128xf32>
    %cst_39 = arith.constant dense<0.000000e+00> : vector<2xf32>
    %74 = vector.multi_reduction <add>, %73, %cst_39 [1] : vector<2x128xf32> to vector<2xf32>
    %75 = vector.shape_cast %74 : vector<2xf32> to vector<2x1xf32>
    %76 = vector.broadcast %75 : vector<2x1xf32> to vector<2x128xf32>
    %77 = arith.divf %73, %76 : vector<2x128xf32>
    %78 = arith.select %57, %77, %49 : vector<2x128xi1>, vector<2x128xf32>
    %79 = arith.select %52, %64, %78 : vector<2x128xi1>, vector<2x128xf32>
    %c0_40 = arith.constant 0 : index
    %c0_41 = arith.constant 0 : index
    %80 = vector.load %arg12[%c0_40, %c0_41] : memref<2x128xf32, #tpu.memory_space<vmem>>, vector<2x128xf32>
    tpu.vector_store %arg12[%c0_40, %c0_41], %79 {strides = array<i32>} : memref<2x128xf32, #tpu.memory_space<vmem>>, vector<2x128xf32>,
    return
  }
  func.func @transform_0(%arg0: i32) -> (i32, i32) {
    %c0_i32 = arith.constant 0 : i32
    %c0_i32_0 = arith.constant 0 : i32
    return %arg0, %c0_i32 : i32, i32
  }
  func.func @transform_1(%arg0: i32) -> (i32, i32) {
    %c0_i32 = arith.constant 0 : i32
    %c0_i32_0 = arith.constant 0 : i32
    %c0_i32_1 = arith.constant 0 : i32
    return %c0_i32, %c0_i32_0 : i32, i32
  }
  func.func @transform_2(%arg0: i32) -> (i32, i32) {
    %c0_i32 = arith.constant 0 : i32
    %c0_i32_0 = arith.constant 0 : i32
    %c0_i32_1 = arith.constant 0 : i32
    return %c0_i32, %c0_i32_0 : i32, i32
  }
  func.func @transform_3(%arg0: i32) -> (i32, i32) {
    %c0_i32 = arith.constant 0 : i32
    %c0_i32_0 = arith.constant 0 : i32
    %c0_i32_1 = arith.constant 0 : i32
    return %c0_i32, %c0_i32_0 : i32, i32
  }
  func.func @transform_4(%arg0: i32) -> (i32, i32) {
    %c0_i32 = arith.constant 0 : i32
    %c0_i32_0 = arith.constant 0 : i32
    %c0_i32_1 = arith.constant 0 : i32
    return %c0_i32, %c0_i32_0 : i32, i32
  }
  func.func @transform_5(%arg0: i32) -> (i32, i32) {
    %c0_i32 = arith.constant 0 : i32
    %c0_i32_0 = arith.constant 0 : i32
    %c0_i32_1 = arith.constant 0 : i32
    return %c0_i32, %c0_i32_0 : i32, i32
  }
  func.func @transform_6(%arg0: i32) -> (i32, i32) {
    %c0_i32 = arith.constant 0 : i32
    %c0_i32_0 = arith.constant 0 : i32
    %c0_i32_1 = arith.constant 0 : i32
    return %c0_i32, %c0_i32_0 : i32, i32
  }
  func.func @transform_7(%arg0: i32) -> (i32, i32) {
    %c0_i32 = arith.constant 0 : i32
    %c0_i32_0 = arith.constant 0 : i32
    %c0_i32_1 = arith.constant 0 : i32
    return %c0_i32, %c0_i32_0 : i32, i32
  }
  func.func @transform_8(%arg0: i32) -> (i32, i32) {
    %c0_i32 = arith.constant 0 : i32
    %c0_i32_0 = arith.constant 0 : i32
    %c0_i32_1 = arith.constant 0 : i32
    return %c0_i32, %c0_i32_0 : i32, i32
  }
  func.func @transform_9(%arg0: i32) -> (i32, i32) {
    %c0_i32 = arith.constant 0 : i32
    %c0_i32_0 = arith.constant 0 : i32
    %c0_i32_1 = arith.constant 0 : i32
    return %c0_i32, %c0_i32_0 : i32, i32
  }
  func.func @transform_10(%arg0: i32) -> (i32, i32) {
    %c0_i32 = arith.constant 0 : i32
    %c0_i32_0 = arith.constant 0 : i32
    %c0_i32_1 = arith.constant 0 : i32
    return %c0_i32, %c0_i32_0 : i32, i32
  }
  func.func @transform_11(%arg0: i32) -> (i32, i32) {
    %c0_i32 = arith.constant 0 : i32
    %c0_i32_0 = arith.constant 0 : i32
    return %arg0, %c0_i32 : i32, i32
  }
}

</mosaic_0001>

<bundles_post_ra>
// kernel: forward_fused.1
= control target key start
LH: loop header
LB: loop body
LE: loop exit
PB: predicated region body
PF: predicated region fallthrough
CT: control target
= control target key end

     0   :  { %16 = vsyncpa [#allocation3], 0  ;;  %s4946_s0 = inlined_call_operand.vmem [shape: bf16[2,1024], index: 0, kind: input, shape index: {}]   ;;  %s4947_s1 = inlined_call_operand.hbm [shape: bf16[1024,512], index: 1, kind: input, shape index: {}]   ;;  %s4948_s2 = inlined_call_operand.hbm [shape: bf16[512,256], index: 2, kind: input, shape index: {}]   ;;  %s4949_s3 = inlined_call_operand.vmem [shape: bf16[256,64], index: 3, kind: input, shape index: {}]   ;;  %s4950_s4 = inlined_call_operand.vmem [shape: bf16[64,32], index: 4, kind: input, shape index: {}]   ;;  %s4951_s5 = inlined_call_operand.vmem [shape: bf16[32,128], index: 5, kind: input, shape index: {}]   ;;  %s4952_s6 = inlined_call_operand.vmem [shape: f32[1,512], index: 6, kind: input, shape index: {}]   ;;  %s4953_s7 = inlined_call_operand.vmem [shape: f32[1,256], index: 7, kind: input, shape index: {}]   ;;  %s4954_s8 = inlined_call_operand.vmem [shape: f32[1,64], index: 8, kind: input, shape index: {}]   ;;  %s4955_s9 = inlined_call_operand.vmem [shape: f32[1,32], index: 9, kind: input, shape index: {}]   ;;  %s4956_s10 = inlined_call_operand.vmem [shape: f32[1,128], index: 10, kind: input, shape index: {}]   ;;  %s4957_s11 = inlined_call_operand.vmem [shape: f32[2,128], index: 11, kind: output, shape index: {}]  }
   0x1   :  { %s24_s19 = sshll.u32 %s4947_s1, 4  ;;  %s25_s19 = int_to_ptr.hbm [resolvable:$true] %s24_s19 }
   0x2   :  { %17 = vsyncpa [#allocation5], 0  ;;  %s4677_s20 = smov [#allocation2]   ;;  %s37_s24 = sshll.u32 %s4948_s2, 4  ;;  %s38_s24 = int_to_ptr.hbm [resolvable:$true] %s37_s24 }
   0x3   :  { %s26_s21 = sshll.u32 %s4677_s20, 4  ;;  %s4678_s25 = smov 256   ;;  %s27_s21 = int_to_ptr.vmem [resolvable:$true] %s26_s21 }
   0x4   :  { %s4679_s26 = smov 16   ;;  %s4680_s27 = smov [#allocation4]  }
   0x5   :  { %32 = dma.hbm_to_vmem [thread:$0]  %s25_s19, 32768, %s27_s21, [#allocation3], %s4678_s25, %s4678_s25, %s4679_s26  }
   0x6   :  { %s39_s28 = sshll.u32 %s4680_s27, 4  ;;  %s4681_s29 = smov 128   ;;  %s40_s28 = int_to_ptr.vmem [resolvable:$true] %s39_s28 }
   0x7   :  { %s4682_s30 = smov 8  }
   0x8   :  { %45 = dma.hbm_to_vmem [thread:$0]  %s38_s24, 8192, %s40_s28, [#allocation5], %s4681_s29, %s4681_s29, %s4682_s30  }
   0x9   :  { %4673 = dma.done.wait [#allocation3], 32768  }
   0xa   :  { %4674 = vsyncadd [#allocation3], 4294934528 }
   0xb   :  { %4675 = dma.done.wait [#allocation5], 8192  }
   0xc   :  { %4676 = vsyncadd [#allocation5], 4294959104  ;;  %v3001_v0 = vld [vmem:[#allocation2 + $0xe0] sm:$0xf]  ;;  %v4287_v1 = vld [vmem:[#allocation2 + $0xec] sm:$0xf0] }
   0xd   :  { %v3129_v2 = vld [vmem:[#allocation2 + $0x1e0] sm:$0xf]  ;;  %v3002_v3 = vor.u32 %v4287_v1, %v3001_v0  ;;  %v4319_v4 = vld [vmem:[#allocation2 + $0x1ec] sm:$0xf0]  ;;  %vm2768_vm7 = vcmask 523264   ;;  %vm2809_vm9 = vcmask 261120  }
   0xe   :  { %v3257_v5 = vld [vmem:[#allocation2 + $0x2e0] sm:$0xf]  ;;  %v4351_v6 = vld [vmem:[#allocation2 + $0x2ec] sm:$0xf0]  ;;  %v3130_v7 = vor.u32 %v4319_v4, %v3129_v2  ;;  %vm2852_vm13 = vcmask 1041408  }
   0xf   :  { %v3258_v8 = vor.u32 %v4351_v6, %v3257_v5  ;;  %v3385_v9 = vld [vmem:[#allocation2 + $0x3e0] sm:$0xf]  ;;  %v4383_v10 = vld [vmem:[#allocation2 + $0x3ec] sm:$0xf0]  ;;  %1636 = vmatpush.bf16.msra.mxu0 %v3002_v3 }
  0x10   :  { %v2985_v11 = vld [vmem:[#allocation2 + $0xc0] sm:$0xf]  ;;  %v3386_v12 = vor.u32 %v4383_v10, %v3385_v9  ;;  %v4283_v13 = vld [vmem:[#allocation2 + $0xcc] sm:$0xf0]  ;;  %1649 = vmatpush.bf16.msra.mxu1 %v3130_v7 }
  0x11   :  { %v3113_v14 = vld [vmem:[#allocation2 + $0x1c0] sm:$0xf]  ;;  %v4315_v15 = vld [vmem:[#allocation2 + $0x1cc] sm:$0xf0]  ;;  %1662 = vmatpush.bf16.msra.mxu2 %v3258_v8  ;;  %v2986_v16 = vor.u32 %v4283_v13, %v2985_v11 }
  0x12   :  { %v3114_v17 = vor.u32 %v4315_v15, %v3113_v14  ;;  %v3241_v18 = vld [vmem:[#allocation2 + $0x2c0] sm:$0xf]  ;;  %v4347_v19 = vld [vmem:[#allocation2 + $0x2cc] sm:$0xf0]  ;;  %1675 = vmatpush.bf16.msra.mxu3 %v3386_v12 }
  0x13   :  { %v3369_v20 = vld [vmem:[#allocation2 + $0x3c0] sm:$0xf]  ;;  %v3242_v21 = vor.u32 %v4347_v19, %v3241_v18  ;;  %v4379_v22 = vld [vmem:[#allocation2 + $0x3cc] sm:$0xf0]  ;;  %1637 = vmatpush.bf16.msra.mxu0 %v2986_v16 }
  0x14   :  { %v2969_v23 = vld [vmem:[#allocation2 + $0xa0] sm:$0xf]  ;;  %v4279_v24 = vld [vmem:[#allocation2 + $0xac] sm:$0xf0]  ;;  %v3370_v25 = vor.u32 %v4379_v22, %v3369_v20  ;;  %1650 = vmatpush.bf16.msra.mxu1 %v3114_v17 }
  0x15   :  { %v3097_v26 = vld [vmem:[#allocation2 + $0x1a0] sm:$0xf]  ;;  %v4311_v27 = vld [vmem:[#allocation2 + $0x1ac] sm:$0xf0]  ;;  %v2970_v29 = vor.u32 %v4279_v24, %v2969_v23  ;;  %1663 = vmatpush.bf16.msra.mxu2 %v3242_v21 }
  0x16   :  { %v3225_v28 = vld [vmem:[#allocation2 + $0x2a0] sm:$0xf]  ;;  %v4343_v30 = vld [vmem:[#allocation2 + $0x2ac] sm:$0xf0]  ;;  %v3098_v33 = vor.u32 %v4311_v27, %v3097_v26  ;;  %1676 = vmatpush.bf16.msra.mxu3 %v3370_v25 }
  0x17   :  { %v3353_v31 = vld [vmem:[#allocation2 + $0x3a0] sm:$0xf]  ;;  %v4375_v32 = vld [vmem:[#allocation2 + $0x3ac] sm:$0xf0]  ;;  %v3226_v34 = vor.u32 %v4343_v30, %v3225_v28  ;;  %1638 = vmatpush.bf16.msra.mxu0 %v2970_v29 }
  0x18   :  { %v2953_v35 = vld [vmem:[#allocation2 + $0x80] sm:$0xf]  ;;  %v4275_v36 = vld [vmem:[#allocation2 + $0x8c] sm:$0xf0]  ;;  %v3354_v38 = vor.u32 %v4375_v32, %v3353_v31  ;;  %1651 = vmatpush.bf16.msra.mxu1 %v3098_v33 }
  0x19   :  { %v3081_v37 = vld [vmem:[#allocation2 + $0x180] sm:$0xf]  ;;  %v4307_v39 = vld [vmem:[#allocation2 + $0x18c] sm:$0xf0]  ;;  %v2954_v44 = vor.u32 %v4275_v36, %v2953_v35  ;;  %1664 = vmatpush.bf16.msra.mxu2 %v3226_v34 }
  0x1a   :  { %v3209_v40 = vld [vmem:[#allocation2 + $0x280] sm:$0xf]  ;;  %v4339_v41 = vld [vmem:[#allocation2 + $0x28c] sm:$0xf0]  ;;  %v3082_v45 = vor.u32 %v4307_v39, %v3081_v37  ;;  %1677 = vmatpush.bf16.msra.mxu3 %v3354_v38 }
  0x1b   :  { %v3337_v42 = vld [vmem:[#allocation2 + $0x380] sm:$0xf]  ;;  %v4371_v43 = vld [vmem:[#allocation2 + $0x38c] sm:$0xf0]  ;;  %v3210_v46 = vor.u32 %v4339_v41, %v3209_v40  ;;  %1639 = vmatpush.bf16.msra.mxu0 %v2954_v44 }
  0x1c   :  { %v2937_v47 = vld [vmem:[#allocation2 + $0x60] sm:$0xf]  ;;  %v4271_v48 = vld [vmem:[#allocation2 + $0x6c] sm:$0xf0]  ;;  %v3338_v50 = vor.u32 %v4371_v43, %v3337_v42  ;;  %1652 = vmatpush.bf16.msra.mxu1 %v3082_v45 }
  0x1d   :  { %v3065_v49 = vld [vmem:[#allocation2 + $0x160] sm:$0xf]  ;;  %v4303_v51 = vld [vmem:[#allocation2 + $0x16c] sm:$0xf0]  ;;  %v2938_v56 = vor.u32 %v4271_v48, %v2937_v47  ;;  %1665 = vmatpush.bf16.msra.mxu2 %v3210_v46 }
  0x1e   :  { %v3193_v52 = vld [vmem:[#allocation2 + $0x260] sm:$0xf]  ;;  %v4335_v53 = vld [vmem:[#allocation2 + $0x26c] sm:$0xf0]  ;;  %v3066_v57 = vor.u32 %v4303_v51, %v3065_v49  ;;  %1678 = vmatpush.bf16.msra.mxu3 %v3338_v50 }
  0x1f   :  { %v3321_v54 = vld [vmem:[#allocation2 + $0x360] sm:$0xf]  ;;  %v4367_v55 = vld [vmem:[#allocation2 + $0x36c] sm:$0xf0]  ;;  %v3194_v58 = vor.u32 %v4335_v53, %v3193_v52  ;;  %1640 = vmatpush.bf16.msra.mxu0 %v2938_v56 }
  0x20   :  { %v2921_v59 = vld [vmem:[#allocation2 + $0x40] sm:$0xf]  ;;  %v4267_v60 = vld [vmem:[#allocation2 + $0x4c] sm:$0xf0]  ;;  %v3322_v62 = vor.u32 %v4367_v55, %v3321_v54  ;;  %1653 = vmatpush.bf16.msra.mxu1 %v3066_v57 }
  0x21   :  { %v3049_v61 = vld [vmem:[#allocation2 + $0x140] sm:$0xf]  ;;  %v4299_v63 = vld [vmem:[#allocation2 + $0x14c] sm:$0xf0]  ;;  %v2922_v4 = vor.u32 %v4267_v60, %v2921_v59  ;;  %1666 = vmatpush.bf16.msra.mxu2 %v3194_v58  ;;  %v71_v59 = vld [vmem:[%s4946_s0] sm:$0xff] }
  0x22   :  { %v3177_v0 = vld [vmem:[#allocation2 + $0x240] sm:$0xf]  ;;  %v4331_v1 = vld [vmem:[#allocation2 + $0x24c] sm:$0xf0]  ;;  %v3050_v5 = vor.u32 %v4299_v63, %v3049_v61  ;;  %1679 = vmatpush.bf16.msra.mxu3 %v3322_v62  ;;  %339 = vst [vmem:[#allocation1] ss:$9 sm:$0xff] %v71_v59 }
  0x23   :  { %v3305_v2 = vld [vmem:[#allocation2 + $0x340] sm:$0xf]  ;;  %v4363_v3 = vld [vmem:[#allocation2 + $0x34c] sm:$0xf0]  ;;  %v3178_v6 = vor.u32 %v4331_v1, %v3177_v0  ;;  %1641 = vmatpush.bf16.msra.mxu0 %v2922_v4 }
  0x24   :  { %v2905_v7 = vld [vmem:[#allocation2 + $0x20] sm:$0xf]  ;;  %v4263_v8 = vld [vmem:[#allocation2 + $0x2c] sm:$0xf0]  ;;  %v3306_v10 = vor.u32 %v4363_v3, %v3305_v2  ;;  %1654 = vmatpush.bf16.msra.mxu1 %v3050_v5 }
  0x25   :  { %v3033_v9 = vld [vmem:[#allocation2 + $0x120] sm:$0xf]  ;;  %v4295_v11 = vld [vmem:[#allocation2 + $0x12c] sm:$0xf0]  ;;  %v2906_v16 = vor.u32 %v4263_v8, %v2905_v7  ;;  %1667 = vmatpush.bf16.msra.mxu2 %v3178_v6 }
  0x26   :  { %v3161_v12 = vld [vmem:[#allocation2 + $0x220] sm:$0xf]  ;;  %v4327_v13 = vld [vmem:[#allocation2 + $0x22c] sm:$0xf0]  ;;  %v3034_v19 = vor.u32 %v4295_v11, %v3033_v9  ;;  %1680 = vmatpush.bf16.msra.mxu3 %v3306_v10 }
  0x27   :  { %v3289_v14 = vld [vmem:[#allocation2 + $0x320] sm:$0xf]  ;;  %v4359_v15 = vld [vmem:[#allocation2 + $0x32c] sm:$0xf0]  ;;  %v3162_v20 = vor.u32 %v4327_v13, %v3161_v12  ;;  %1642 = vmatpush.bf16.msra.mxu0 %v2906_v16 }
  0x28   :  { %v2889_v17 = vld [vmem:[#allocation2] sm:$0xf]  ;;  %v4259_v18 = vld [vmem:[#allocation2 + $0xc] sm:$0xf0]  ;;  %v3290_v24 = vor.u32 %v4359_v15, %v3289_v14  ;;  %1655 = vmatpush.bf16.msra.mxu1 %v3034_v19 }
  0x29   :  { %v3017_v21 = vld [vmem:[#allocation2 + $0x100] sm:$0xf]  ;;  %v4291_v22 = vld [vmem:[#allocation2 + $0x10c] sm:$0xf0]  ;;  %v2890_v31 = vor.u32 %v4259_v18, %v2889_v17  ;;  %1668 = vmatpush.bf16.msra.mxu2 %v3162_v20 }
  0x2a   :  { %v3145_v23 = vld [vmem:[#allocation2 + $0x200] sm:$0xf]  ;;  %v4323_v25 = vld [vmem:[#allocation2 + $0x20c] sm:$0xf0]  ;;  %v3018_v35 = vor.u32 %v4291_v22, %v3017_v21  ;;  %1681 = vmatpush.bf16.msra.mxu3 %v3290_v24  ;;  %v4754_v21 = vld [vmem:[#allocation1] sm:$0xff] }
  0x2b   :  { %v3273_v26 = vld [vmem:[#allocation2 + $0x300] sm:$0xf]  ;;  %v4355_v27 = vld [vmem:[#allocation2 + $0x30c] sm:$0xf0]  ;;  %v3146_v36 = vor.u32 %v4323_v25, %v3145_v23  ;;  %1643 = vmatpush.bf16.msra.mxu0 %v2890_v31 }
  0x2c   :  { %v3513_v28 = vld [vmem:[#allocation2 + $0x4e0] sm:$0xf]  ;;  %v4415_v29 = vld [vmem:[#allocation2 + $0x4ec] sm:$0xf0]  ;;  %v3274_v39 = vor.u32 %v4355_v27, %v3273_v26  ;;  %1656 = vmatpush.bf16.msra.mxu1 %v3018_v35 }
  0x2d   :  { %v3641_v30 = vld [vmem:[#allocation2 + $0x5e0] sm:$0xf]  ;;  %v4447_v32 = vld [vmem:[#allocation2 + $0x5ec] sm:$0xf0]  ;;  %v3514_v40 = vor.u32 %v4415_v29, %v3513_v28  ;;  %1669 = vmatpush.bf16.msra.mxu2 %v3146_v36 }
  0x2e   :  { %v3769_v33 = vld [vmem:[#allocation2 + $0x6e0] sm:$0xf]  ;;  %v4479_v34 = vld [vmem:[#allocation2 + $0x6ec] sm:$0xf0]  ;;  %v3642_v41 = vor.u32 %v4447_v32, %v3641_v30  ;;  %1682 = vmatpush.bf16.msra.mxu3 %v3274_v39  ;;  %1644 = vmatmul.bf16.vlgmr.msra.gmra.mxu0 %v4754_v21 }
  0x2f   :  { %v3897_v37 = vld [vmem:[#allocation2 + $0x7e0] sm:$0xf]  ;;  %v4511_v38 = vld [vmem:[#allocation2 + $0x7ec] sm:$0xf0]  ;;  %v3770_v42 = vor.u32 %v4479_v34, %v3769_v33  ;;  %1688 = vmatpush.bf16.msrb.mxu0 %v3514_v40 }
  0x30   :  { %v3497_v43 = vld [vmem:[#allocation2 + $0x4c0] sm:$0xf]  ;;  %v4411_v44 = vld [vmem:[#allocation2 + $0x4cc] sm:$0xf0]  ;;  %v3898_v46 = vor.u32 %v4511_v38, %v3897_v37  ;;  %1701 = vmatpush.bf16.msrb.mxu1 %v3642_v41 }
  0x31   :  { %v3625_v45 = vld [vmem:[#allocation2 + $0x5c0] sm:$0xf]  ;;  %v4443_v47 = vld [vmem:[#allocation2 + $0x5cc] sm:$0xf0]  ;;  %v3498_v52 = vor.u32 %v4411_v44, %v3497_v43  ;;  %1714 = vmatpush.bf16.msrb.mxu2 %v3770_v42 }
  0x32   :  { %v3753_v48 = vld [vmem:[#allocation2 + $0x6c0] sm:$0xf]  ;;  %v4475_v49 = vld [vmem:[#allocation2 + $0x6cc] sm:$0xf0]  ;;  %v3626_v55 = vor.u32 %v4443_v47, %v3625_v45  ;;  %1727 = vmatpush.bf16.msrb.mxu3 %v3898_v46 }
  0x33   :  { %v3881_v50 = vld [vmem:[#allocation2 + $0x7c0] sm:$0xf]  ;;  %v4507_v51 = vld [vmem:[#allocation2 + $0x7cc] sm:$0xf0]  ;;  %v3754_v56 = vor.u32 %v4475_v49, %v3753_v48  ;;  %1689 = vmatpush.bf16.msrb.mxu0 %v3498_v52 }
  0x34   :  { %v3481_v53 = vld [vmem:[#allocation2 + $0x4a0] sm:$0xf]  ;;  %v4407_v54 = vld [vmem:[#allocation2 + $0x4ac] sm:$0xf0]  ;;  %v3882_v60 = vor.u32 %v4507_v51, %v3881_v50  ;;  %1702 = vmatpush.bf16.msrb.mxu1 %v3626_v55 }
  0x35   :  { %v3609_v57 = vld [vmem:[#allocation2 + $0x5a0] sm:$0xf]  ;;  %v4439_v58 = vld [vmem:[#allocation2 + $0x5ac] sm:$0xf0]  ;;  %v3482_v1 = vor.u32 %v4407_v54, %v3481_v53  ;;  %1715 = vmatpush.bf16.msrb.mxu2 %v3754_v56 }
  0x36   :  { %v3737_v61 = vld [vmem:[#allocation2 + $0x6a0] sm:$0xf]  ;;  %v4471_v62 = vld [vmem:[#allocation2 + $0x6ac] sm:$0xf0]  ;;  %v3610_v2 = vor.u32 %v4439_v58, %v3609_v57  ;;  %1728 = vmatpush.bf16.msrb.mxu3 %v3882_v60 }
  0x37   :  { %v3865_v63 = vld [vmem:[#allocation2 + $0x7a0] sm:$0xf]  ;;  %v4503_v0 = vld [vmem:[#allocation2 + $0x7ac] sm:$0xf0]  ;;  %v3738_v3 = vor.u32 %v4471_v62, %v3737_v61  ;;  %1690 = vmatpush.bf16.msrb.mxu0 %v3482_v1  ;;  %v4285_v1 = vld [vmem:[#allocation2 + $0xe4] sm:$0xf] }
  0x38   :  { %v3465_v4 = vld [vmem:[#allocation2 + $0x480] sm:$0xf]  ;;  %v4403_v5 = vld [vmem:[#allocation2 + $0x48c] sm:$0xf0]  ;;  %v3866_v7 = vor.u32 %v4503_v0, %v3865_v63  ;;  %1703 = vmatpush.bf16.msrb.mxu1 %v3610_v2  ;;  %v3003_v2 = vld [vmem:[#allocation2 + $0xf0] sm:$0xf0] }
  0x39   :  { %v3593_v6 = vld [vmem:[#allocation2 + $0x580] sm:$0xf]  ;;  %v4435_v8 = vld [vmem:[#allocation2 + $0x58c] sm:$0xf0]  ;;  %v3466_v14 = vor.u32 %v4403_v5, %v3465_v4  ;;  %1716 = vmatpush.bf16.msrb.mxu2 %v3738_v3  ;;  %v4317_v3 = vld [vmem:[#allocation2 + $0x1e4] sm:$0xf] }
  0x3a   :  { %v3721_v9 = vld [vmem:[#allocation2 + $0x680] sm:$0xf]  ;;  %v4467_v10 = vld [vmem:[#allocation2 + $0x68c] sm:$0xf0]  ;;  %v3594_v18 = vor.u32 %v4435_v8, %v3593_v6  ;;  %1729 = vmatpush.bf16.msrb.mxu3 %v3866_v7  ;;  %v3131_v5 = vld [vmem:[#allocation2 + $0x1f0] sm:$0xf0] }
  0x3b   :  { %v3849_v11 = vld [vmem:[#allocation2 + $0x780] sm:$0xf]  ;;  %v4499_v12 = vld [vmem:[#allocation2 + $0x78c] sm:$0xf0]  ;;  %v3722_v19 = vor.u32 %v4467_v10, %v3721_v9  ;;  %1691 = vmatpush.bf16.msrb.mxu0 %v3466_v14  ;;  %v4349_v6 = vld [vmem:[#allocation2 + $0x2e4] sm:$0xf]  ;;  %v3134_v14 = vor.u32 %v4317_v3, %v3131_v5 }
  0x3c   :  { %v3449_v13 = vld [vmem:[#allocation2 + $0x460] sm:$0xf]  ;;  %v4399_v15 = vld [vmem:[#allocation2 + $0x46c] sm:$0xf0]  ;;  %v3850_v23 = vor.u32 %v4499_v12, %v3849_v11  ;;  %1704 = vmatpush.bf16.msrb.mxu1 %v3594_v18  ;;  %v3259_v7 = vld [vmem:[#allocation2 + $0x2f0] sm:$0xf0] }
  0x3d   :  { %v3577_v16 = vld [vmem:[#allocation2 + $0x560] sm:$0xf]  ;;  %v4431_v17 = vld [vmem:[#allocation2 + $0x56c] sm:$0xf0]  ;;  %v3450_v29 = vor.u32 %v4399_v15, %v3449_v13  ;;  %1717 = vmatpush.bf16.msrb.mxu2 %v3722_v19  ;;  %v4381_v10 = vld [vmem:[#allocation2 + $0x3e4] sm:$0xf]  ;;  %v3006_v13 = vor.u32 %v4285_v1, %v3003_v2  ;;  %v3262_v15 = vor.u32 %v4349_v6, %v3259_v7 }
  0x3e   :  { %v4752_v20 = vld [vmem:[#allocation1 + $0x12] sm:$0xff]  ;;  %v4756_v22 = vld [vmem:[#allocation1 + $0x1b] sm:$0xff]  ;;  %v3705_v24 = vld [vmem:[#allocation2 + $0x660] sm:$0xf]  ;;  %v3578_v30 = vor.u32 %v4431_v17, %v3577_v16  ;;  %1730 = vmatpush.bf16.msrb.mxu3 %v3850_v23 }
  0x3f   :  { %v4463_v25 = vld [vmem:[#allocation2 + $0x66c] sm:$0xf0]  ;;  %1670 = vmatmul.bf16.vlgmr.msra.gmra.mxu2 %v4752_v20  ;;  %v4759_v26 = vld [vmem:[#allocation1 + $0x9] sm:$0xff]  ;;  %1683 = vmatmul.bf16.vlgmr.msra.gmra.mxu3 %v4756_v22  ;;  %v3387_v11 = vld [vmem:[#allocation2 + $0x3f0] sm:$0xf0] }
  0x40   :  { %v3833_v27 = vld [vmem:[#allocation2 + $0x760] sm:$0xf]  ;;  %v4495_v28 = vld [vmem:[#allocation2 + $0x76c] sm:$0xf0]  ;;  %1657 = vmatmul.bf16.vlgmr.msra.gmra.mxu1 %v4759_v26  ;;  %v3706_v31 = vor.u32 %v4463_v25, %v3705_v24  ;;  %1692 = vmatpush.bf16.msrb.mxu0 %v3450_v29  ;;  %v4281_v16 = vld [vmem:[#allocation2 + $0xc4] sm:$0xf]  ;;  %v3390_v19 = vor.u32 %v4381_v10, %v3387_v11 }
  0x41   :  { %v3433_v32 = vld [vmem:[#allocation2 + $0x440] sm:$0xf]  ;;  %v4395_v33 = vld [vmem:[#allocation2 + $0x44c] sm:$0xf0]  ;;  %v3834_v35 = vor.u32 %v4495_v28, %v3833_v27  ;;  %1705 = vmatpush.bf16.msrb.mxu1 %v3578_v30  ;;  %v2987_v17 = vld [vmem:[#allocation2 + $0xd0] sm:$0xf0] }
  0x42   :  { %v3561_v34 = vld [vmem:[#allocation2 + $0x540] sm:$0xf]  ;;  %v4427_v36 = vld [vmem:[#allocation2 + $0x54c] sm:$0xf0]  ;;  %v3434_v41 = vor.u32 %v4395_v33, %v3433_v32  ;;  %1718 = vmatpush.bf16.msrb.mxu2 %v3706_v31  ;;  %v4313_v18 = vld [vmem:[#allocation2 + $0x1c4] sm:$0xf]  ;;  %v2990_v30 = vor.u32 %v4281_v16, %v2987_v17 }
  0x43   :  { %v3689_v37 = vld [vmem:[#allocation2 + $0x640] sm:$0xf]  ;;  %v4459_v38 = vld [vmem:[#allocation2 + $0x64c] sm:$0xf0]  ;;  %v3562_v42 = vor.u32 %v4427_v36, %v3561_v34  ;;  %1731 = vmatpush.bf16.msrb.mxu3 %v3834_v35  ;;  %v3115_v23 = vld [vmem:[#allocation2 + $0x1d0] sm:$0xf0] }
  0x44   :  { %v3817_v39 = vld [vmem:[#allocation2 + $0x740] sm:$0xf]  ;;  %v4491_v40 = vld [vmem:[#allocation2 + $0x74c] sm:$0xf0]  ;;  %v3690_v43 = vor.u32 %v4459_v38, %v3689_v37  ;;  %1693 = vmatpush.bf16.msrb.mxu0 %v3434_v41  ;;  %v4345_v24 = vld [vmem:[#allocation2 + $0x2c4] sm:$0xf]  ;;  %v3118_v34 = vor.u32 %v4313_v18, %v3115_v23 }
  0x45   :  { %v3417_v44 = vld [vmem:[#allocation2 + $0x420] sm:$0xf]  ;;  %v4391_v45 = vld [vmem:[#allocation2 + $0x42c] sm:$0xf0]  ;;  %v3818_v47 = vor.u32 %v4491_v40, %v3817_v39  ;;  %1706 = vmatpush.bf16.msrb.mxu1 %v3562_v42  ;;  %v3243_v25 = vld [vmem:[#allocation2 + $0x2d0] sm:$0xf0] }
  0x46   :  { %v3545_v46 = vld [vmem:[#allocation2 + $0x520] sm:$0xf]  ;;  %v4423_v48 = vld [vmem:[#allocation2 + $0x52c] sm:$0xf0]  ;;  %v3418_v53 = vor.u32 %v4391_v45, %v3417_v44  ;;  %1719 = vmatpush.bf16.msrb.mxu2 %v3690_v43  ;;  %v4377_v27 = vld [vmem:[#allocation2 + $0x3c4] sm:$0xf]  ;;  %v3246_v35 = vor.u32 %v4345_v24, %v3243_v25 }
  0x47   :  { %v3673_v49 = vld [vmem:[#allocation2 + $0x620] sm:$0xf]  ;;  %v4455_v50 = vld [vmem:[#allocation2 + $0x62c] sm:$0xf0]  ;;  %v3546_v56 = vor.u32 %v4423_v48, %v3545_v46  ;;  %1732 = vmatpush.bf16.msrb.mxu3 %v3818_v47  ;;  %v3371_v28 = vld [vmem:[#allocation2 + $0x3d0] sm:$0xf0] }
  0x48   :  { %v3801_v51 = vld [vmem:[#allocation2 + $0x720] sm:$0xf]  ;;  %v4487_v52 = vld [vmem:[#allocation2 + $0x72c] sm:$0xf0]  ;;  %v3674_v57 = vor.u32 %v4455_v50, %v3673_v49  ;;  %1694 = vmatpush.bf16.msrb.mxu0 %v3418_v53  ;;  %v4768_v32 = vld [vmem:[#allocation1 + $0x3f] sm:$0xff]  ;;  %v3374_v39 = vor.u32 %v4377_v27, %v3371_v28 }
  0x49   :  { %v3401_v54 = vld [vmem:[#allocation2 + $0x400] sm:$0xf]  ;;  %v4387_v55 = vld [vmem:[#allocation2 + $0x40c] sm:$0xf0]  ;;  %v3802_v61 = vor.u32 %v4487_v52, %v3801_v51  ;;  %1707 = vmatpush.bf16.msrb.mxu1 %v3546_v56  ;;  %v4277_v33 = vld [vmem:[#allocation2 + $0xa4] sm:$0xf] }
  0x4a   :  { %v3529_v58 = vld [vmem:[#allocation2 + $0x500] sm:$0xf]  ;;  %v4419_v59 = vld [vmem:[#allocation2 + $0x50c] sm:$0xf0]  ;;  %v3402_v4 = vor.u32 %v4387_v55, %v3401_v54  ;;  %1720 = vmatpush.bf16.msrb.mxu2 %v3674_v57  ;;  %v2971_v36 = vld [vmem:[#allocation2 + $0xb0] sm:$0xf0] }
  0x4b   :  { %v3657_v60 = vld [vmem:[#allocation2 + $0x600] sm:$0xf]  ;;  %v4451_v62 = vld [vmem:[#allocation2 + $0x60c] sm:$0xf0]  ;;  %v3530_v8 = vor.u32 %v4419_v59, %v3529_v58  ;;  %1733 = vmatpush.bf16.msrb.mxu3 %v3802_v61  ;;  %v4309_v37 = vld [vmem:[#allocation2 + $0x1a4] sm:$0xf]  ;;  %v2974_v45 = vor.u32 %v4277_v33, %v2971_v36 }
  0x4c   :  { %v3785_v63 = vld [vmem:[#allocation2 + $0x700] sm:$0xf]  ;;  %v4483_v0 = vld [vmem:[#allocation2 + $0x70c] sm:$0xf0]  ;;  %v3658_v9 = vor.u32 %v4451_v62, %v3657_v60  ;;  %1695 = vmatpush.bf16.msrb.mxu0 %v3402_v4  ;;  %v4770_v38 = vld [vmem:[#allocation1 + $0x2d] sm:$0xff] }
  0x4d   :  { %v3786_v12 = vor.u32 %v4483_v0, %v3785_v63  ;;  %1708 = vmatpush.bf16.msrb.mxu1 %v3530_v8  ;;  %v4764_v29 = vld [vmem:[#allocation1 + $0x36] sm:$0xff]  ;;  %v4766_v31 = vld [vmem:[#allocation1 + $0x24] sm:$0xff]  ;;  %v4341_v41 = vld [vmem:[#allocation2 + $0x2a4] sm:$0xf] }
  0x4e   :  { %1721 = vmatpush.bf16.msrb.mxu2 %v3658_v9  ;;  %v3099_v40 = vld [vmem:[#allocation2 + $0x1b0] sm:$0xf0]  ;;  %v4373_v43 = vld [vmem:[#allocation2 + $0x3a4] sm:$0xf] }
  0x4f   :  { %1734 = vmatpush.bf16.msrb.mxu3 %v3786_v12  ;;  %v3227_v42 = vld [vmem:[#allocation2 + $0x2b0] sm:$0xf0]  ;;  %1696 = vmatmul.bf16.vlgmr.msrb.gmra.mxu0 %v4766_v31  ;;  %v3102_v46 = vor.u32 %v4309_v37, %v3099_v40  ;;  %v4273_v48 = vld [vmem:[#allocation2 + $0x84] sm:$0xf] }
  0x50   :  { %1740 = vmatpush.bf16.msra.mxu0 %v3006_v13  ;;  %v3355_v44 = vld [vmem:[#allocation2 + $0x3b0] sm:$0xf0]  ;;  %1709 = vmatmul.bf16.vlgmr.msrb.gmra.mxu1 %v4770_v38  ;;  %v3230_v47 = vor.u32 %v4341_v41, %v3227_v42  ;;  %v4305_v50 = vld [vmem:[#allocation2 + $0x184] sm:$0xf] }
  0x51   :  { %1753 = vmatpush.bf16.msra.mxu1 %v3134_v14  ;;  %1722 = vmatmul.bf16.vlgmr.msrb.gmra.mxu2 %v4764_v29  ;;  %v2955_v49 = vld [vmem:[#allocation2 + $0x90] sm:$0xf0]  ;;  %v3358_v51 = vor.u32 %v4373_v43, %v3355_v44  ;;  %v4337_v53 = vld [vmem:[#allocation2 + $0x284] sm:$0xf] }
  0x52   :  { %1766 = vmatpush.bf16.msra.mxu2 %v3262_v15  ;;  %1735 = vmatmul.bf16.vlgmr.msrb.gmra.mxu3 %v4768_v32  ;;  %v3083_v52 = vld [vmem:[#allocation2 + $0x190] sm:$0xf0]  ;;  %v4369_v55 = vld [vmem:[#allocation2 + $0x384] sm:$0xf]  ;;  %v2958_v57 = vor.u32 %v4273_v48, %v2955_v49 }
  0x53   :  { %1779 = vmatpush.bf16.msra.mxu3 %v3390_v19  ;;  %v3211_v54 = vld [vmem:[#allocation2 + $0x290] sm:$0xf0]  ;;  %v3086_v58 = vor.u32 %v4305_v50, %v3083_v52  ;;  %v4269_v60 = vld [vmem:[#allocation2 + $0x64] sm:$0xf] }
  0x54   :  { %1741 = vmatpush.bf16.msra.mxu0 %v2990_v30  ;;  %v3339_v56 = vld [vmem:[#allocation2 + $0x390] sm:$0xf0]  ;;  %v3214_v59 = vor.u32 %v4337_v53, %v3211_v54  ;;  %v4301_v62 = vld [vmem:[#allocation2 + $0x164] sm:$0xf] }
  0x55   :  { %1754 = vmatpush.bf16.msra.mxu1 %v3118_v34  ;;  %v2939_v61 = vld [vmem:[#allocation2 + $0x70] sm:$0xf0]  ;;  %v3342_v63 = vor.u32 %v4369_v55, %v3339_v56  ;;  %v4333_v1 = vld [vmem:[#allocation2 + $0x264] sm:$0xf] }
  0x56   :  { %1767 = vmatpush.bf16.msra.mxu2 %v3246_v35  ;;  %v3067_v0 = vld [vmem:[#allocation2 + $0x170] sm:$0xf0]  ;;  %v4365_v3 = vld [vmem:[#allocation2 + $0x364] sm:$0xf]  ;;  %v2942_v5 = vor.u32 %v4269_v60, %v2939_v61 }
  0x57   :  { %1780 = vmatpush.bf16.msra.mxu3 %v3374_v39  ;;  %v3195_v2 = vld [vmem:[#allocation2 + $0x270] sm:$0xf0]  ;;  %v3070_v6 = vor.u32 %v4301_v62, %v3067_v0  ;;  %v4265_v8 = vld [vmem:[#allocation2 + $0x44] sm:$0xf] }
  0x58   :  { %1742 = vmatpush.bf16.msra.mxu0 %v2974_v45  ;;  %v3323_v4 = vld [vmem:[#allocation2 + $0x370] sm:$0xf0]  ;;  %v3198_v7 = vor.u32 %v4333_v1, %v3195_v2  ;;  %v4297_v10 = vld [vmem:[#allocation2 + $0x144] sm:$0xf] }
  0x59   :  { %1755 = vmatpush.bf16.msra.mxu1 %v3102_v46  ;;  %v2923_v9 = vld [vmem:[#allocation2 + $0x50] sm:$0xf0]  ;;  %v3326_v11 = vor.u32 %v4365_v3, %v3323_v4  ;;  %v4329_v13 = vld [vmem:[#allocation2 + $0x244] sm:$0xf] }
  0x5a   :  { %1768 = vmatpush.bf16.msra.mxu2 %v3230_v47  ;;  %v3051_v12 = vld [vmem:[#allocation2 + $0x150] sm:$0xf0]  ;;  %v4361_v15 = vld [vmem:[#allocation2 + $0x344] sm:$0xf]  ;;  %v2926_v17 = vor.u32 %v4265_v8, %v2923_v9 }
  0x5b   :  { %1781 = vmatpush.bf16.msra.mxu3 %v3358_v51  ;;  %v3179_v14 = vld [vmem:[#allocation2 + $0x250] sm:$0xf0]  ;;  %v4261_v18 = vld [vmem:[#allocation2 + $0x24] sm:$0xf]  ;;  %v3054_v19 = vor.u32 %v4297_v10, %v3051_v12 }
  0x5c   :  { %1743 = vmatpush.bf16.msra.mxu0 %v2958_v57  ;;  %v3307_v16 = vld [vmem:[#allocation2 + $0x350] sm:$0xf0]  ;;  %v3182_v23 = vor.u32 %v4329_v13, %v3179_v14  ;;  %v4293_v25 = vld [vmem:[#allocation2 + $0x124] sm:$0xf] }
  0x5d   :  { %1756 = vmatpush.bf16.msra.mxu1 %v3086_v58  ;;  %v2907_v24 = vld [vmem:[#allocation2 + $0x30] sm:$0xf0]  ;;  %v3310_v28 = vor.u32 %v4361_v15, %v3307_v16  ;;  %v4325_v30 = vld [vmem:[#allocation2 + $0x224] sm:$0xf] }
  0x5e   :  { %1769 = vmatpush.bf16.msra.mxu2 %v3214_v59  ;;  %v3035_v27 = vld [vmem:[#allocation2 + $0x130] sm:$0xf0]  ;;  %v4357_v34 = vld [vmem:[#allocation2 + $0x324] sm:$0xf]  ;;  %v2910_v39 = vor.u32 %v4261_v18, %v2907_v24 }
  0x5f   :  { %1782 = vmatpush.bf16.msra.mxu3 %v3342_v63  ;;  %v3163_v33 = vld [vmem:[#allocation2 + $0x230] sm:$0xf0]  ;;  %v4257_v36 = vld [vmem:[#allocation2 + $0x4] sm:$0xf]  ;;  %v3038_v43 = vor.u32 %v4293_v25, %v3035_v27 }
  0x60   :  { %1744 = vmatpush.bf16.msra.mxu0 %v2942_v5  ;;  %v3291_v35 = vld [vmem:[#allocation2 + $0x330] sm:$0xf0]  ;;  %v4289_v40 = vld [vmem:[#allocation2 + $0x104] sm:$0xf]  ;;  %v3166_v44 = vor.u32 %v4325_v30, %v3163_v33 }
  0x61   :  { %1757 = vmatpush.bf16.msra.mxu1 %v3070_v6  ;;  %v2891_v37 = vld [vmem:[#allocation2 + $0x10] sm:$0xf0]  ;;  %v4321_v42 = vld [vmem:[#allocation2 + $0x204] sm:$0xf]  ;;  %v3294_v48 = vor.u32 %v4357_v34, %v3291_v35 }
  0x62   :  { %1770 = vmatpush.bf16.msra.mxu2 %v3198_v7  ;;  %v3019_v41 = vld [vmem:[#allocation2 + $0x110] sm:$0xf0]  ;;  %v4353_v46 = vld [vmem:[#allocation2 + $0x304] sm:$0xf]  ;;  %v2894_v52 = vor.u32 %v4257_v36, %v2891_v37 }
  0x63   :  { %1783 = vmatpush.bf16.msra.mxu3 %v3326_v11  ;;  %v3147_v45 = vld [vmem:[#allocation2 + $0x210] sm:$0xf0]  ;;  %v4413_v49 = vld [vmem:[#allocation2 + $0x4e4] sm:$0xf]  ;;  %v3022_v56 = vor.u32 %v4289_v40, %v3019_v41 }
  0x64   :  { %1745 = vmatpush.bf16.msra.mxu0 %v2926_v17  ;;  %v3275_v47 = vld [vmem:[#allocation2 + $0x310] sm:$0xf0]  ;;  %v4445_v51 = vld [vmem:[#allocation2 + $0x5e4] sm:$0xf]  ;;  %v3150_v57 = vor.u32 %v4321_v42, %v3147_v45 }
  0x65   :  { %1758 = vmatpush.bf16.msra.mxu1 %v3054_v19  ;;  %v3515_v50 = vld [vmem:[#allocation2 + $0x4f0] sm:$0xf0]  ;;  %v4477_v54 = vld [vmem:[#allocation2 + $0x6e4] sm:$0xf]  ;;  %v3278_v60 = vor.u32 %v4353_v46, %v3275_v47 }
  0x66   :  { %1771 = vmatpush.bf16.msra.mxu2 %v3182_v23  ;;  %v3643_v53 = vld [vmem:[#allocation2 + $0x5f0] sm:$0xf0]  ;;  %v4509_v58 = vld [vmem:[#allocation2 + $0x7e4] sm:$0xf]  ;;  %v3518_v61 = vor.u32 %v4413_v49, %v3515_v50 }
  0x67   :  { %1784 = vmatpush.bf16.msra.mxu3 %v3310_v28  ;;  %v3771_v55 = vld [vmem:[#allocation2 + $0x6f0] sm:$0xf0]  ;;  %v3646_v62 = vor.u32 %v4445_v51, %v3643_v53  ;;  %v4409_v0 = vld [vmem:[#allocation2 + $0x4c4] sm:$0xf] }
  0x68   :  { %1746 = vmatpush.bf16.msra.mxu0 %v2910_v39  ;;  %v3899_v59 = vld [vmem:[#allocation2 + $0x7f0] sm:$0xf0]  ;;  %v3774_v63 = vor.u32 %v4477_v54, %v3771_v55  ;;  %v4441_v2 = vld [vmem:[#allocation2 + $0x5c4] sm:$0xf] }
  0x69   :  { %1759 = vmatpush.bf16.msra.mxu1 %v3038_v43  ;;  %v3499_v1 = vld [vmem:[#allocation2 + $0x4d0] sm:$0xf0]  ;;  %v3902_v3 = vor.u32 %v4509_v58, %v3899_v59  ;;  %v4473_v5 = vld [vmem:[#allocation2 + $0x6c4] sm:$0xf] }
  0x6a   :  { %1772 = vmatpush.bf16.msra.mxu2 %v3166_v44  ;;  %v3627_v4 = vld [vmem:[#allocation2 + $0x5d0] sm:$0xf0]  ;;  %v4505_v7 = vld [vmem:[#allocation2 + $0x7c4] sm:$0xf]  ;;  %v3502_v9 = vor.u32 %v4409_v0, %v3499_v1 }
  0x6b   :  { %1785 = vmatpush.bf16.msra.mxu3 %v3294_v48  ;;  %v3755_v6 = vld [vmem:[#allocation2 + $0x6d0] sm:$0xf0]  ;;  %v3630_v10 = vor.u32 %v4441_v2, %v3627_v4  ;;  %v4405_v12 = vld [vmem:[#allocation2 + $0x4a4] sm:$0xf] }
  0x6c   :  { %1747 = vmatpush.bf16.msra.mxu0 %v2894_v52  ;;  %v3883_v8 = vld [vmem:[#allocation2 + $0x7d0] sm:$0xf0]  ;;  %v3758_v11 = vor.u32 %v4473_v5, %v3755_v6  ;;  %v4437_v14 = vld [vmem:[#allocation2 + $0x5a4] sm:$0xf] }
  0x6d   :  { %1760 = vmatpush.bf16.msra.mxu1 %v3022_v56  ;;  %v3483_v13 = vld [vmem:[#allocation2 + $0x4b0] sm:$0xf0]  ;;  %v3886_v15 = vor.u32 %v4505_v7, %v3883_v8  ;;  %v4469_v17 = vld [vmem:[#allocation2 + $0x6a4] sm:$0xf] }
  0x6e   :  { %1773 = vmatpush.bf16.msra.mxu2 %v3150_v57  ;;  %v3611_v16 = vld [vmem:[#allocation2 + $0x5b0] sm:$0xf0]  ;;  %v4501_v19 = vld [vmem:[#allocation2 + $0x7a4] sm:$0xf]  ;;  %v3486_v24 = vor.u32 %v4405_v12, %v3483_v13 }
  0x6f   :  { %1786 = vmatpush.bf16.msra.mxu3 %v3278_v60  ;;  %v3739_v18 = vld [vmem:[#allocation2 + $0x6b0] sm:$0xf0]  ;;  %1748 = vmatmul.bf16.vlgmr.msra.gmra.mxu0 %v4754_v21  ;;  %v3614_v25 = vor.u32 %v4437_v14, %v3611_v16  ;;  %v4401_v28 = vld [vmem:[#allocation2 + $0x484] sm:$0xf] }
  0x70   :  { %1792 = vmatpush.bf16.msrb.mxu0 %v3518_v61  ;;  %v3867_v23 = vld [vmem:[#allocation2 + $0x7b0] sm:$0xf0]  ;;  %1761 = vmatmul.bf16.vlgmr.msra.gmra.mxu1 %v4759_v26  ;;  %v3742_v27 = vor.u32 %v4469_v17, %v3739_v18  ;;  %v4433_v33 = vld [vmem:[#allocation2 + $0x584] sm:$0xf] }
  0x71   :  { %1805 = vmatpush.bf16.msrb.mxu1 %v3646_v62  ;;  %1774 = vmatmul.bf16.vlgmr.msra.gmra.mxu2 %v4752_v20  ;;  %v3467_v30 = vld [vmem:[#allocation2 + $0x490] sm:$0xf0]  ;;  %v3870_v34 = vor.u32 %v4501_v19, %v3867_v23  ;;  %v4465_v36 = vld [vmem:[#allocation2 + $0x684] sm:$0xf] }
  0x72   :  { %1818 = vmatpush.bf16.msrb.mxu2 %v3774_v63  ;;  %1787 = vmatmul.bf16.vlgmr.msra.gmra.mxu3 %v4756_v22  ;;  %v3595_v35 = vld [vmem:[#allocation2 + $0x590] sm:$0xf0]  ;;  %v4497_v39 = vld [vmem:[#allocation2 + $0x784] sm:$0xf]  ;;  %v3470_v22 = vor.u32 %v4401_v28, %v3467_v30  ;;  %v4288_v28 = vld [vmem:[#allocation2 + $0xf4] sm:$0xf0] }
  0x73   :  { %1831 = vmatpush.bf16.msrb.mxu3 %v3902_v3  ;;  %v3723_v37 = vld [vmem:[#allocation2 + $0x690] sm:$0xf0]  ;;  %v3598_v40 = vor.u32 %v4433_v33, %v3595_v35  ;;  %v4397_v42 = vld [vmem:[#allocation2 + $0x464] sm:$0xf]  ;;  %v3137_v30 = vld [vmem:[#allocation2 + $0x1e8] sm:$0xf] }
  0x74   :  { %1793 = vmatpush.bf16.msrb.mxu0 %v3502_v9  ;;  %v3851_v21 = vld [vmem:[#allocation2 + $0x790] sm:$0xf0]  ;;  %v3726_v41 = vor.u32 %v4465_v36, %v3723_v37  ;;  %v4429_v44 = vld [vmem:[#allocation2 + $0x564] sm:$0xf]  ;;  %v3265_v35 = vld [vmem:[#allocation2 + $0x2e8] sm:$0xf] }
  0x75   :  { %1806 = vmatpush.bf16.msrb.mxu1 %v3630_v10  ;;  %v3451_v43 = vld [vmem:[#allocation2 + $0x470] sm:$0xf0]  ;;  %v3854_v45 = vor.u32 %v4497_v39, %v3851_v21  ;;  %v4461_v47 = vld [vmem:[#allocation2 + $0x664] sm:$0xf]  ;;  %v4352_v36 = vld [vmem:[#allocation2 + $0x2f4] sm:$0xf0] }
  0x76   :  { %1819 = vmatpush.bf16.msrb.mxu2 %v3758_v11  ;;  %v3579_v46 = vld [vmem:[#allocation2 + $0x570] sm:$0xf0]  ;;  %v4493_v49 = vld [vmem:[#allocation2 + $0x764] sm:$0xf]  ;;  %v3454_v51 = vor.u32 %v4397_v42, %v3451_v43  ;;  %v3393_v21 = vld [vmem:[#allocation2 + $0x3e8] sm:$0xf]  ;;  %v3266_v43 = vor.u32 %v4352_v36, %v3265_v35 }
  0x77   :  { %1832 = vmatpush.bf16.msrb.mxu3 %v3886_v15  ;;  %v3707_v48 = vld [vmem:[#allocation2 + $0x670] sm:$0xf0]  ;;  %v3582_v52 = vor.u32 %v4429_v44, %v3579_v46  ;;  %v4393_v54 = vld [vmem:[#allocation2 + $0x444] sm:$0xf]  ;;  %v2993_v44 = vld [vmem:[#allocation2 + $0xc8] sm:$0xf] }
  0x78   :  { %1794 = vmatpush.bf16.msrb.mxu0 %v3486_v24  ;;  %v3835_v50 = vld [vmem:[#allocation2 + $0x770] sm:$0xf0]  ;;  %v3710_v53 = vor.u32 %v4461_v47, %v3707_v48  ;;  %v4425_v56 = vld [vmem:[#allocation2 + $0x544] sm:$0xf]  ;;  %v3121_v46 = vld [vmem:[#allocation2 + $0x1c8] sm:$0xf] }
  0x79   :  { %1807 = vmatpush.bf16.msrb.mxu1 %v3614_v25  ;;  %v3435_v55 = vld [vmem:[#allocation2 + $0x450] sm:$0xf0]  ;;  %v3838_v57 = vor.u32 %v4493_v49, %v3835_v50  ;;  %v4457_v59 = vld [vmem:[#allocation2 + $0x644] sm:$0xf]  ;;  %v4316_v48 = vld [vmem:[#allocation2 + $0x1d4] sm:$0xf0] }
  0x7a   :  { %1820 = vmatpush.bf16.msrb.mxu2 %v3742_v27  ;;  %v3563_v58 = vld [vmem:[#allocation2 + $0x550] sm:$0xf0]  ;;  %v4489_v61 = vld [vmem:[#allocation2 + $0x744] sm:$0xf]  ;;  %v3438_v63 = vor.u32 %v4393_v54, %v3435_v55  ;;  %v3009_v27 = vld [vmem:[#allocation2 + $0xe8] sm:$0xf]  ;;  %v3122_v54 = vor.u32 %v4316_v48, %v3121_v46 }
  0x7b   :  { %1833 = vmatpush.bf16.msrb.mxu3 %v3870_v34  ;;  %v3691_v60 = vld [vmem:[#allocation2 + $0x650] sm:$0xf0]  ;;  %v3566_v0 = vor.u32 %v4425_v56, %v3563_v58  ;;  %v4389_v2 = vld [vmem:[#allocation2 + $0x424] sm:$0xf]  ;;  %v4320_v34 = vld [vmem:[#allocation2 + $0x1f4] sm:$0xf0] }
  0x7c   :  { %1795 = vmatpush.bf16.msrb.mxu0 %v3470_v22  ;;  %v3819_v62 = vld [vmem:[#allocation2 + $0x750] sm:$0xf0]  ;;  %v3694_v1 = vor.u32 %v4457_v59, %v3691_v60  ;;  %v4421_v4 = vld [vmem:[#allocation2 + $0x524] sm:$0xf]  ;;  %v4384_v22 = vld [vmem:[#allocation2 + $0x3f4] sm:$0xf0]  ;;  %v3138_v42 = vor.u32 %v4320_v34, %v3137_v30 }
  0x7d   :  { %1808 = vmatpush.bf16.msrb.mxu1 %v3598_v40  ;;  %v3419_v3 = vld [vmem:[#allocation2 + $0x430] sm:$0xf0]  ;;  %v3822_v5 = vor.u32 %v4489_v61, %v3819_v62  ;;  %v4453_v7 = vld [vmem:[#allocation2 + $0x624] sm:$0xf]  ;;  %v3394_v47 = vor.u32 %v4384_v22, %v3393_v21  ;;  %v3249_v49 = vld [vmem:[#allocation2 + $0x2c8] sm:$0xf] }
  0x7e   :  { %1821 = vmatpush.bf16.msrb.mxu2 %v3726_v41  ;;  %v3547_v6 = vld [vmem:[#allocation2 + $0x530] sm:$0xf0]  ;;  %v4485_v9 = vld [vmem:[#allocation2 + $0x724] sm:$0xf]  ;;  %v3422_v11 = vor.u32 %v4389_v2, %v3419_v3  ;;  %v3010_v41 = vor.u32 %v4288_v28, %v3009_v27  ;;  %v4348_v50 = vld [vmem:[#allocation2 + $0x2d4] sm:$0xf0] }
  0x7f   :  { %1834 = vmatpush.bf16.msrb.mxu3 %v3854_v45  ;;  %v3675_v8 = vld [vmem:[#allocation2 + $0x630] sm:$0xf0]  ;;  %v4385_v12 = vld [vmem:[#allocation2 + $0x404] sm:$0xf]  ;;  %v3550_v14 = vor.u32 %v4421_v4, %v3547_v6  ;;  %v4284_v45 = vld [vmem:[#allocation2 + $0xd4] sm:$0xf0]  ;;  %v3250_v55 = vor.u32 %v4348_v50, %v3249_v49 }
  0x80   :  { %1796 = vmatpush.bf16.msrb.mxu0 %v3454_v51  ;;  %v3803_v10 = vld [vmem:[#allocation2 + $0x730] sm:$0xf0]  ;;  %v3678_v15 = vor.u32 %v4453_v7, %v3675_v8  ;;  %v4417_v16 = vld [vmem:[#allocation2 + $0x504] sm:$0xf]  ;;  %v3377_v51 = vld [vmem:[#allocation2 + $0x3c8] sm:$0xf] }
  0x81   :  { %1809 = vmatpush.bf16.msrb.mxu1 %v3582_v52  ;;  %v3403_v13 = vld [vmem:[#allocation2 + $0x410] sm:$0xf0]  ;;  %v4449_v18 = vld [vmem:[#allocation2 + $0x604] sm:$0xf]  ;;  %v3806_v19 = vor.u32 %v4485_v9, %v3803_v10  ;;  %v4380_v52 = vld [vmem:[#allocation2 + $0x3d4] sm:$0xf0] }
  0x82   :  { %1822 = vmatpush.bf16.msrb.mxu2 %v3710_v53  ;;  %v3531_v17 = vld [vmem:[#allocation2 + $0x510] sm:$0xf0]  ;;  %v4481_v24 = vld [vmem:[#allocation2 + $0x704] sm:$0xf]  ;;  %v3406_v33 = vor.u32 %v4385_v12, %v3403_v13  ;;  %v2994_v53 = vor.u32 %v4284_v45, %v2993_v44  ;;  %v2977_v56 = vld [vmem:[#allocation2 + $0xa8] sm:$0xf]  ;;  %v3378_v59 = vor.u32 %v4380_v52, %v3377_v51 }
  0x83   :  { %1835 = vmatpush.bf16.msrb.mxu3 %v3838_v57  ;;  %v3659_v23 = vld [vmem:[#allocation2 + $0x610] sm:$0xf0]  ;;  %v3534_v37 = vor.u32 %v4417_v16, %v3531_v17  ;;  %v4280_v57 = vld [vmem:[#allocation2 + $0xb4] sm:$0xf0]  ;;  %v3105_v58 = vld [vmem:[#allocation2 + $0x1a8] sm:$0xf] }
  0x84   :  { %1797 = vmatpush.bf16.msrb.mxu0 %v3438_v63  ;;  %v3787_v25 = vld [vmem:[#allocation2 + $0x710] sm:$0xf0]  ;;  %v3662_v39 = vor.u32 %v4449_v18, %v3659_v23  ;;  %v4312_v60 = vld [vmem:[#allocation2 + $0x1b4] sm:$0xf0]  ;;  %v3233_v61 = vld [vmem:[#allocation2 + $0x2a8] sm:$0xf] }
  0x85   :  { %1810 = vmatpush.bf16.msrb.mxu1 %v3566_v0  ;;  %v3790_v40 = vor.u32 %v4481_v24, %v3787_v25  ;;  %v4344_v62 = vld [vmem:[#allocation2 + $0x2b4] sm:$0xf0]  ;;  %v3361_v63 = vld [vmem:[#allocation2 + $0x3a8] sm:$0xf]  ;;  %v3106_v2 = vor.u32 %v4312_v60, %v3105_v58 }
  0x86   :  { %1823 = vmatpush.bf16.msrb.mxu2 %v3694_v1  ;;  %v4376_v0 = vld [vmem:[#allocation2 + $0x3b4] sm:$0xf0]  ;;  %v2978_v1 = vor.u32 %v4280_v57, %v2977_v56  ;;  %v3234_v3 = vor.u32 %v4344_v62, %v3233_v61  ;;  %v2961_v4 = vld [vmem:[#allocation2 + $0x88] sm:$0xf] }
  0x87   :  { %1836 = vmatpush.bf16.msrb.mxu3 %v3822_v5  ;;  %v4276_v5 = vld [vmem:[#allocation2 + $0x94] sm:$0xf0]  ;;  %v3362_v6 = vor.u32 %v4376_v0, %v3361_v63  ;;  %v3217_v8 = vld [vmem:[#allocation2 + $0x288] sm:$0xf] }
  0x88   :  { %1798 = vmatpush.bf16.msrb.mxu0 %v3422_v11  ;;  %v4308_v7 = vld [vmem:[#allocation2 + $0x194] sm:$0xf0]  ;;  %v3345_v9 = vld [vmem:[#allocation2 + $0x388] sm:$0xf]  ;;  %v2962_v10 = vor.u32 %v4276_v5, %v2961_v4 }
  0x89   :  { %1811 = vmatpush.bf16.msrb.mxu1 %v3550_v14  ;;  %v2945_v12 = vld [vmem:[#allocation2 + $0x68] sm:$0xf]  ;;  %v4272_v13 = vld [vmem:[#allocation2 + $0x74] sm:$0xf0] }
  0x8a   :  { %1824 = vmatpush.bf16.msrb.mxu2 %v3678_v15  ;;  %v3073_v14 = vld [vmem:[#allocation2 + $0x168] sm:$0xf]  ;;  %v4304_v16 = vld [vmem:[#allocation2 + $0x174] sm:$0xf0]  ;;  %v2946_v24 = vor.u32 %v4272_v13, %v2945_v12 }
  0x8b   :  { %1837 = vmatpush.bf16.msrb.mxu3 %v3806_v19  ;;  %v3201_v17 = vld [vmem:[#allocation2 + $0x268] sm:$0xf]  ;;  %v4336_v18 = vld [vmem:[#allocation2 + $0x274] sm:$0xf0]  ;;  %v3074_v25 = vor.u32 %v4304_v16, %v3073_v14 }
  0x8c   :  { %1799 = vmatpush.bf16.msrb.mxu0 %v3406_v33  ;;  %v3329_v19 = vld [vmem:[#allocation2 + $0x368] sm:$0xf]  ;;  %v4368_v23 = vld [vmem:[#allocation2 + $0x374] sm:$0xf0]  ;;  %v3202_v27 = vor.u32 %v4336_v18, %v3201_v17 }
  0x8d   :  { %1812 = vmatpush.bf16.msrb.mxu1 %v3534_v37  ;;  %v2929_v28 = vld [vmem:[#allocation2 + $0x48] sm:$0xf]  ;;  %v4268_v30 = vld [vmem:[#allocation2 + $0x54] sm:$0xf0]  ;;  %v3330_v34 = vor.u32 %v4368_v23, %v3329_v19 }
  0x8e   :  { %1825 = vmatpush.bf16.msrb.mxu2 %v3662_v39  ;;  %v3057_v33 = vld [vmem:[#allocation2 + $0x148] sm:$0xf]  ;;  %v4300_v35 = vld [vmem:[#allocation2 + $0x154] sm:$0xf0]  ;;  %v2930_v22 = vor.u32 %v4268_v30, %v2929_v28 }
  0x8f   :  { %1838 = vmatpush.bf16.msrb.mxu3 %v3790_v40  ;;  %1800 = vmatmul.bf16.vlgmr.msrb.gmra.mxu0 %v4766_v31  ;;  %v4340_v31 = vld [vmem:[#allocation2 + $0x294] sm:$0xf0]  ;;  %v3185_v36 = vld [vmem:[#allocation2 + $0x248] sm:$0xf]  ;;  %v3058_v40 = vor.u32 %v4300_v35, %v3057_v33 }
  0x90   :  { %1844 = vmatpush.bf16.msra.mxu0 %v3010_v41  ;;  %1813 = vmatmul.bf16.vlgmr.msrb.gmra.mxu1 %v4770_v38  ;;  %v3218_v38 = vor.u32 %v4340_v31, %v3217_v8  ;;  %v4332_v37 = vld [vmem:[#allocation2 + $0x254] sm:$0xf0]  ;;  %v3313_v39 = vld [vmem:[#allocation2 + $0x348] sm:$0xf] }
  0x91   :  { %1857 = vmatpush.bf16.msra.mxu1 %v3138_v42  ;;  %1826 = vmatmul.bf16.vlgmr.msrb.gmra.mxu2 %v4764_v29  ;;  %v3089_v29 = vld [vmem:[#allocation2 + $0x188] sm:$0xf]  ;;  %v4364_v21 = vld [vmem:[#allocation2 + $0x354] sm:$0xf0]  ;;  %v3186_v41 = vor.u32 %v4332_v37, %v3185_v36 }
  0x92   :  { %1870 = vmatpush.bf16.msra.mxu2 %v3266_v43  ;;  %1839 = vmatmul.bf16.vlgmr.msrb.gmra.mxu3 %v4768_v32  ;;  %v4372_v32 = vld [vmem:[#allocation2 + $0x394] sm:$0xf0]  ;;  %v3090_v11 = vor.u32 %v4308_v7, %v3089_v29  ;;  %v2913_v42 = vld [vmem:[#allocation2 + $0x28] sm:$0xf]  ;;  %v3314_v45 = vor.u32 %v4364_v21, %v3313_v39 }
  0x93   :  { %1883 = vmatpush.bf16.msra.mxu3 %v3394_v47  ;;  %v3346_v15 = vor.u32 %v4372_v32, %v3345_v9  ;;  %v4264_v43 = vld [vmem:[#allocation2 + $0x34] sm:$0xf0]  ;;  %v3041_v44 = vld [vmem:[#allocation2 + $0x128] sm:$0xf] }
  0x94   :  { %1845 = vmatpush.bf16.msra.mxu0 %v2994_v53  ;;  %v4296_v46 = vld [vmem:[#allocation2 + $0x134] sm:$0xf0]  ;;  %v3169_v47 = vld [vmem:[#allocation2 + $0x228] sm:$0xf]  ;;  %v2914_v51 = vor.u32 %v4264_v43, %v2913_v42 }
  0x95   :  { %1858 = vmatpush.bf16.msra.mxu1 %v3122_v54  ;;  %v4328_v48 = vld [vmem:[#allocation2 + $0x234] sm:$0xf0]  ;;  %v3297_v49 = vld [vmem:[#allocation2 + $0x328] sm:$0xf]  ;;  %v3042_v54 = vor.u32 %v4296_v46, %v3041_v44 }
  0x96   :  { %1871 = vmatpush.bf16.msra.mxu2 %v3250_v55  ;;  %v4360_v50 = vld [vmem:[#allocation2 + $0x334] sm:$0xf0]  ;;  %v2897_v52 = vld [vmem:[#allocation2 + $0x8] sm:$0xf]  ;;  %v3170_v55 = vor.u32 %v4328_v48, %v3169_v47 }
  0x97   :  { %1884 = vmatpush.bf16.msra.mxu3 %v3378_v59  ;;  %v4260_v53 = vld [vmem:[#allocation2 + $0x14] sm:$0xf0]  ;;  %v3025_v56 = vld [vmem:[#allocation2 + $0x108] sm:$0xf]  ;;  %v3298_v59 = vor.u32 %v4360_v50, %v3297_v49 }
  0x98   :  { %1846 = vmatpush.bf16.msra.mxu0 %v2978_v1  ;;  %v4292_v57 = vld [vmem:[#allocation2 + $0x114] sm:$0xf0]  ;;  %v3153_v58 = vld [vmem:[#allocation2 + $0x208] sm:$0xf] }
  0x99   :  { %1859 = vmatpush.bf16.msra.mxu1 %v3106_v2  ;;  %v4324_v60 = vld [vmem:[#allocation2 + $0x214] sm:$0xf0]  ;;  %v3281_v61 = vld [vmem:[#allocation2 + $0x308] sm:$0xf]  ;;  %v2898_v2 = vor.u32 %v4260_v53, %v2897_v52  ;;  %v3026_v29 = vor.u32 %v4292_v57, %v3025_v56 }
  0x9a   :  { %1872 = vmatpush.bf16.msra.mxu2 %v3234_v3  ;;  %v4356_v62 = vld [vmem:[#allocation2 + $0x314] sm:$0xf0]  ;;  %v3521_v63 = vld [vmem:[#allocation2 + $0x4e8] sm:$0xf] }
  0x9b   :  { %1885 = vmatpush.bf16.msra.mxu3 %v3362_v6  ;;  %v4416_v0 = vld [vmem:[#allocation2 + $0x4f4] sm:$0xf0]  ;;  %v3649_v1 = vld [vmem:[#allocation2 + $0x5e8] sm:$0xf]  ;;  %v3154_v6 = vor.u32 %v4324_v60, %v3153_v58  ;;  %v3282_v31 = vor.u32 %v4356_v62, %v3281_v61 }
  0x9c   :  { %1847 = vmatpush.bf16.msra.mxu0 %v2962_v10  ;;  %v4448_v3 = vld [vmem:[#allocation2 + $0x5f4] sm:$0xf0]  ;;  %v3777_v4 = vld [vmem:[#allocation2 + $0x6e8] sm:$0xf]  ;;  %v3522_v9 = vor.u32 %v4416_v0, %v3521_v63 }
  0x9d   :  { %1860 = vmatpush.bf16.msra.mxu1 %v3090_v11  ;;  %v4480_v5 = vld [vmem:[#allocation2 + $0x6f4] sm:$0xf0]  ;;  %v3905_v7 = vld [vmem:[#allocation2 + $0x7e8] sm:$0xf]  ;;  %v3650_v32 = vor.u32 %v4448_v3, %v3649_v1 }
  0x9e   :  { %1873 = vmatpush.bf16.msra.mxu2 %v3218_v38  ;;  %v4512_v8 = vld [vmem:[#allocation2 + $0x7f4] sm:$0xf0]  ;;  %v3778_v10 = vor.u32 %v4480_v5, %v3777_v4  ;;  %v3505_v11 = vld [vmem:[#allocation2 + $0x4c8] sm:$0xf] }
  0x9f   :  { %1886 = vmatpush.bf16.msra.mxu3 %v3346_v15  ;;  %v4412_v38 = vld [vmem:[#allocation2 + $0x4d4] sm:$0xf0]  ;;  %v3633_v12 = vld [vmem:[#allocation2 + $0x5c8] sm:$0xf]  ;;  %v3906_v13 = vor.u32 %v4512_v8, %v3905_v7 }
  0xa0   :  { %1848 = vmatpush.bf16.msra.mxu0 %v2946_v24  ;;  %v4444_v14 = vld [vmem:[#allocation2 + $0x5d4] sm:$0xf0]  ;;  %v3761_v15 = vld [vmem:[#allocation2 + $0x6c8] sm:$0xf]  ;;  %v3506_v19 = vor.u32 %v4412_v38, %v3505_v11 }
  0xa1   :  { %1861 = vmatpush.bf16.msra.mxu1 %v3074_v25  ;;  %v4476_v16 = vld [vmem:[#allocation2 + $0x6d4] sm:$0xf0]  ;;  %v3889_v17 = vld [vmem:[#allocation2 + $0x7c8] sm:$0xf]  ;;  %v3634_v23 = vor.u32 %v4444_v14, %v3633_v12 }
  0xa2   :  { %1874 = vmatpush.bf16.msra.mxu2 %v3202_v27  ;;  %v4508_v18 = vld [vmem:[#allocation2 + $0x7d4] sm:$0xf0]  ;;  %v3762_v24 = vor.u32 %v4476_v16, %v3761_v15  ;;  %v3489_v25 = vld [vmem:[#allocation2 + $0x4a8] sm:$0xf] }
  0xa3   :  { %1887 = vmatpush.bf16.msra.mxu3 %v3330_v34  ;;  %v4408_v27 = vld [vmem:[#allocation2 + $0x4b4] sm:$0xf0]  ;;  %v3617_v28 = vld [vmem:[#allocation2 + $0x5a8] sm:$0xf]  ;;  %v3890_v30 = vor.u32 %v4508_v18, %v3889_v17 }
  0xa4   :  { %1849 = vmatpush.bf16.msra.mxu0 %v2930_v22  ;;  %v4440_v33 = vld [vmem:[#allocation2 + $0x5b4] sm:$0xf0]  ;;  %v3745_v34 = vld [vmem:[#allocation2 + $0x6a8] sm:$0xf]  ;;  %v3490_v22 = vor.u32 %v4408_v27, %v3489_v25 }
  0xa5   :  { %1862 = vmatpush.bf16.msra.mxu1 %v3058_v40  ;;  %v4472_v35 = vld [vmem:[#allocation2 + $0x6b4] sm:$0xf0]  ;;  %v3873_v36 = vld [vmem:[#allocation2 + $0x7a8] sm:$0xf]  ;;  %v3618_v40 = vor.u32 %v4440_v33, %v3617_v28 }
  0xa6   :  { %1875 = vmatpush.bf16.msra.mxu2 %v3186_v41  ;;  %v4504_v37 = vld [vmem:[#allocation2 + $0x7b4] sm:$0xf0]  ;;  %v3746_v41 = vor.u32 %v4472_v35, %v3745_v34  ;;  %v3473_v42 = vld [vmem:[#allocation2 + $0x488] sm:$0xf] }
  0xa7   :  { %1888 = vmatpush.bf16.msra.mxu3 %v3314_v45  ;;  %v4785_v39 = vld [vmem:[#allocation1] sm:$0xff]  ;;  %v3601_v43 = vld [vmem:[#allocation2 + $0x588] sm:$0xf]  ;;  %v3874_v44 = vor.u32 %v4504_v37, %v3873_v36 }
  0xa8   :  { %1850 = vmatpush.bf16.msra.mxu0 %v2914_v51  ;;  %v4788_v21 = vld [vmem:[#allocation1 + $0x1b] sm:$0xff]  ;;  %v3729_v46 = vld [vmem:[#allocation2 + $0x688] sm:$0xf] }
  0xa9   :  { %1863 = vmatpush.bf16.msra.mxu1 %v3042_v54  ;;  %v4436_v45 = vld [vmem:[#allocation2 + $0x594] sm:$0xf0]  ;;  %v3857_v48 = vld [vmem:[#allocation2 + $0x788] sm:$0xf] }
  0xaa   :  { %1876 = vmatpush.bf16.msra.mxu2 %v3170_v55  ;;  %v4468_v47 = vld [vmem:[#allocation2 + $0x694] sm:$0xf0]  ;;  %v3457_v51 = vld [vmem:[#allocation2 + $0x468] sm:$0xf] }
  0xab   :  { %1889 = vmatpush.bf16.msra.mxu3 %v3298_v59  ;;  %v4500_v49 = vld [vmem:[#allocation2 + $0x794] sm:$0xf0]  ;;  %v3730_v52 = vor.u32 %v4468_v47, %v3729_v46  ;;  %v3585_v54 = vld [vmem:[#allocation2 + $0x568] sm:$0xf]  ;;  %v3011_v46 = vld [vmem:[#allocation2 + $0xf8] sm:$0xf0] }
  0xac   :  { %1851 = vmatpush.bf16.msra.mxu0 %v2898_v2  ;;  %v4400_v53 = vld [vmem:[#allocation2 + $0x474] sm:$0xf0]  ;;  %v3858_v56 = vor.u32 %v4500_v49, %v3857_v48  ;;  %v3713_v57 = vld [vmem:[#allocation2 + $0x668] sm:$0xf]  ;;  %v4318_v47 = vld [vmem:[#allocation2 + $0x1ec] sm:$0xf] }
  0xad   :  { %1864 = vmatpush.bf16.msra.mxu1 %v3026_v29  ;;  %v4432_v55 = vld [vmem:[#allocation2 + $0x574] sm:$0xf0]  ;;  %v3841_v60 = vld [vmem:[#allocation2 + $0x768] sm:$0xf]  ;;  %v3458_v62 = vor.u32 %v4400_v53, %v3457_v51  ;;  %v3139_v49 = vld [vmem:[#allocation2 + $0x1f8] sm:$0xf0] }
  0xae   :  { %1877 = vmatpush.bf16.msra.mxu2 %v3154_v6  ;;  %v4464_v58 = vld [vmem:[#allocation2 + $0x674] sm:$0xf0]  ;;  %v3441_v63 = vld [vmem:[#allocation2 + $0x448] sm:$0xf]  ;;  %v3586_v0 = vor.u32 %v4432_v55, %v3585_v54  ;;  %v3267_v51 = vld [vmem:[#allocation2 + $0x2f8] sm:$0xf0] }
  0xaf   :  { %1890 = vmatpush.bf16.msra.mxu3 %v3282_v31  ;;  %1852 = vmatmul.bf16.vlgmr.msra.gmra.mxu0 %v4785_v39  ;;  %v4795_v59 = vld [vmem:[%s4952_s6] sm:$0xf]  ;;  %v3714_v1 = vor.u32 %v4464_v58, %v3713_v57  ;;  %v3569_v3 = vld [vmem:[#allocation2 + $0x548] sm:$0xf]  ;;  %v4382_v55 = vld [vmem:[#allocation2 + $0x3ec] sm:$0xf] }
  0xb0   :  { %1896 = vmatpush.bf16.msrb.mxu0 %v3522_v9  ;;  %1865 = vmatmul.bf16.vlgmr.msra.gmra.mxu1 %v4759_v26  ;;  %v3602_v26 = vor.u32 %v4436_v45, %v3601_v43  ;;  %v4496_v61 = vld [vmem:[#allocation2 + $0x774] sm:$0xf0]  ;;  %v330_v4 = vperm.slane %v4795_v59, 0  ;;  %v3697_v6 = vld [vmem:[#allocation2 + $0x648] sm:$0xf] }
  0xb1   :  { %1909 = vmatpush.bf16.msrb.mxu1 %v3650_v32  ;;  %1878 = vmatmul.bf16.vlgmr.msra.gmra.mxu2 %v4752_v20  ;;  %v4404_v20 = vld [vmem:[#allocation2 + $0x494] sm:$0xf0]  ;;  %v3842_v5 = vor.u32 %v4496_v61, %v3841_v60  ;;  %v3825_v8 = vld [vmem:[#allocation2 + $0x748] sm:$0xf]  ;;  %v1645_v32 = vpop.f32.mrf.mxu0  ;;  %v4286_v45 = vld [vmem:[#allocation2 + $0xec] sm:$0xf]  ;;  %v3142_v61 = vor.u32 %v4318_v47, %v3139_v49 }
  0xb2   :  { %1922 = vmatpush.bf16.msrb.mxu2 %v3778_v10  ;;  %1891 = vmatmul.bf16.vlgmr.msra.gmra.mxu3 %v4788_v21  ;;  %v3474_v50 = vor.u32 %v4404_v20, %v3473_v42  ;;  %v4396_v2 = vld [vmem:[#allocation2 + $0x454] sm:$0xf0]  ;;  %v3425_v38 = vld [vmem:[#allocation2 + $0x428] sm:$0xf]  ;;  %v1646_v14 = vadd.f32 %v1645_v32, %v330_v4  ;;  %v3014_v60 = vor.u32 %v4286_v45, %v3011_v46  ;;  %v4346_v4 = vld [vmem:[#allocation2 + $0x2cc] sm:$0xf] }
  0xb3   :  { %1935 = vmatpush.bf16.msrb.mxu3 %v3906_v13  ;;  %v4428_v29 = vld [vmem:[#allocation2 + $0x554] sm:$0xf0]  ;;  %v3442_v9 = vor.u32 %v4396_v2, %v3441_v63  ;;  %v3553_v13 = vld [vmem:[#allocation2 + $0x528] sm:$0xf]  ;;  %v4282_v63 = vld [vmem:[#allocation2 + $0xcc] sm:$0xf] }
  0xb4   :  { %1897 = vmatpush.bf16.msrb.mxu0 %v3506_v19  ;;  %v4460_v7 = vld [vmem:[#allocation2 + $0x654] sm:$0xf0]  ;;  %v3570_v10 = vor.u32 %v4428_v29, %v3569_v3  ;;  %v3681_v18 = vld [vmem:[#allocation2 + $0x628] sm:$0xf]  ;;  %v3123_v3 = vld [vmem:[#allocation2 + $0x1d8] sm:$0xf0] }
  0xb5   :  { %1910 = vmatpush.bf16.msrb.mxu1 %v3634_v23  ;;  %v4492_v31 = vld [vmem:[#allocation2 + $0x754] sm:$0xf0]  ;;  %v3698_v11 = vor.u32 %v4460_v7, %v3697_v6  ;;  %v3809_v23 = vld [vmem:[#allocation2 + $0x728] sm:$0xf]  ;;  %v4378_v29 = vld [vmem:[#allocation2 + $0x3cc] sm:$0xf] }
  0xb6   :  { %1923 = vmatpush.bf16.msrb.mxu2 %v3762_v24  ;;  %v4392_v12 = vld [vmem:[#allocation2 + $0x434] sm:$0xf0]  ;;  %v3826_v16 = vor.u32 %v4492_v31, %v3825_v8  ;;  %v3409_v28 = vld [vmem:[#allocation2 + $0x408] sm:$0xf]  ;;  %v3379_v6 = vld [vmem:[#allocation2 + $0x3d8] sm:$0xf0] }
  0xb7   :  { %1936 = vmatpush.bf16.msrb.mxu3 %v3890_v30  ;;  %v4424_v17 = vld [vmem:[#allocation2 + $0x534] sm:$0xf0]  ;;  %v3426_v27 = vor.u32 %v4392_v12, %v3425_v38  ;;  %v3537_v35 = vld [vmem:[#allocation2 + $0x508] sm:$0xf]  ;;  %v4310_v38 = vld [vmem:[#allocation2 + $0x1ac] sm:$0xf] }
  0xb8   :  { %1898 = vmatpush.bf16.msrb.mxu0 %v3490_v22  ;;  %v4456_v19 = vld [vmem:[#allocation2 + $0x634] sm:$0xf0]  ;;  %v3554_v33 = vor.u32 %v4424_v17, %v3553_v13  ;;  %v3665_v37 = vld [vmem:[#allocation2 + $0x608] sm:$0xf]  ;;  %v4800_v12 = vld [vmem:[#allocation1 + $0x36] sm:$0xff]  ;;  %v3382_v13 = vor.u32 %v4378_v29, %v3379_v6 }
  0xb9   :  { %1911 = vmatpush.bf16.msrb.mxu1 %v3618_v40  ;;  %v4488_v24 = vld [vmem:[#allocation2 + $0x734] sm:$0xf0]  ;;  %v3682_v34 = vor.u32 %v4456_v19, %v3681_v18  ;;  %v3793_v42 = vld [vmem:[#allocation2 + $0x708] sm:$0xf]  ;;  %v4803_v17 = vld [vmem:[#allocation1 + $0x24] sm:$0xff] }
  0xba   :  { %1924 = vmatpush.bf16.msrb.mxu2 %v3746_v41  ;;  %v4388_v30 = vld [vmem:[#allocation2 + $0x414] sm:$0xf0]  ;;  %v3810_v40 = vor.u32 %v4488_v24, %v3809_v23  ;;  %v4374_v19 = vld [vmem:[#allocation2 + $0x3ac] sm:$0xf]  ;;  %v3363_v23 = vld [vmem:[#allocation2 + $0x3b8] sm:$0xf0] }
  0xbb   :  { %1937 = vmatpush.bf16.msrb.mxu3 %v3874_v44  ;;  %v4420_v36 = vld [vmem:[#allocation2 + $0x514] sm:$0xf0]  ;;  %v3410_v48 = vor.u32 %v4388_v30, %v3409_v28  ;;  %v4809_v24 = vld [vmem:[#allocation1 + $0x2d] sm:$0xff]  ;;  %v2947_v46 = vld [vmem:[#allocation2 + $0x78] sm:$0xf0] }
  0xbc   :  { %1899 = vmatpush.bf16.msrb.mxu0 %v3474_v50  ;;  %v4452_v41 = vld [vmem:[#allocation2 + $0x614] sm:$0xf0]  ;;  %v4350_v50 = vld [vmem:[#allocation2 + $0x2ec] sm:$0xf]  ;;  %v3538_v53 = vor.u32 %v4420_v36, %v3537_v35  ;;  %v3366_v35 = vor.u32 %v4374_v19, %v3363_v23  ;;  %v3091_v36 = vld [vmem:[#allocation2 + $0x198] sm:$0xf0] }
  0xbd   :  { %1912 = vmatpush.bf16.msrb.mxu1 %v3602_v26  ;;  %v1658_v15 = vpop.f32.mrf.mxu1  ;;  %v4484_v20 = vld [vmem:[#allocation2 + $0x714] sm:$0xf0]  ;;  %v3666_v54 = vor.u32 %v4452_v41, %v3665_v37  ;;  %v4274_v30 = vld [vmem:[#allocation2 + $0x8c] sm:$0xf]  ;;  %v3347_v41 = vld [vmem:[#allocation2 + $0x398] sm:$0xf0] }
  0xbe   :  { %1925 = vmatpush.bf16.msrb.mxu2 %v3730_v52  ;;  %v1659_v25 = vadd.f32 %v1658_v15, %v1646_v14  ;;  %v1647_v52 = vpop.f32.mrf.mxu0  ;;  %v3794_v58 = vor.u32 %v4484_v20, %v3793_v42  ;;  %v3107_v14 = vld [vmem:[#allocation2 + $0x1b8] sm:$0xf0]  ;;  %v4342_v15 = vld [vmem:[#allocation2 + $0x2ac] sm:$0xf] }
  0xbf   :  { %1938 = vmatpush.bf16.msrb.mxu3 %v3858_v56  ;;  %v3395_v56 = vld [vmem:[#allocation2 + $0x3f8] sm:$0xf0]  ;;  %v4338_v37 = vld [vmem:[#allocation2 + $0x28c] sm:$0xf] }
  0xc0   :  { %1900 = vmatpush.bf16.msrb.mxu0 %v3458_v62  ;;  %v3270_v62 = vor.u32 %v4350_v50, %v3267_v51  ;;  %v3398_v2 = vor.u32 %v4382_v55, %v3395_v56  ;;  %v4806_v18 = vld [vmem:[#allocation1 + $0x3f] sm:$0xff]  ;;  %v4270_v45 = vld [vmem:[#allocation2 + $0x6c] sm:$0xf] }
  0xc1   :  { %1913 = vmatpush.bf16.msrb.mxu1 %v3586_v0  ;;  %v2995_v0 = vld [vmem:[#allocation2 + $0xd8] sm:$0xf0]  ;;  %v4302_v47 = vld [vmem:[#allocation2 + $0x16c] sm:$0xf] }
  0xc2   :  { %1926 = vmatpush.bf16.msrb.mxu2 %v3714_v1  ;;  %v1671_v22 = vpop.f32.mrf.mxu2  ;;  %v1684_v44 = vpop.f32.mrf.mxu3  ;;  %v4314_v1 = vld [vmem:[#allocation2 + $0x1cc] sm:$0xf]  ;;  %v2998_v8 = vor.u32 %v4282_v63, %v2995_v0  ;;  %v3075_v51 = vld [vmem:[#allocation2 + $0x178] sm:$0xf0] }
  0xc3   :  { %1939 = vmatpush.bf16.msrb.mxu3 %v3842_v5  ;;  %v1672_v43 = vadd.f32 %v1671_v22, %v1659_v25  ;;  %v3251_v5 = vld [vmem:[#allocation2 + $0x2d8] sm:$0xf0]  ;;  %v4334_v52 = vld [vmem:[#allocation2 + $0x26c] sm:$0xf] }
  0xc4   :  { %1901 = vmatpush.bf16.msrb.mxu0 %v3442_v9  ;;  %v3126_v9 = vor.u32 %v4314_v1, %v3123_v3  ;;  %v3254_v32 = vor.u32 %v4346_v4, %v3251_v5  ;;  %v3219_v22 = vld [vmem:[#allocation2 + $0x298] sm:$0xf0]  ;;  %v4298_v63 = vld [vmem:[#allocation2 + $0x14c] sm:$0xf] }
  0xc5   :  { %1914 = vmatpush.bf16.msrb.mxu1 %v3570_v10  ;;  %v4798_v26 = vadd.f32 %v1684_v44, %v1672_v43  ;;  %v1660_v57 = vpop.f32.mrf.mxu1  ;;  %v4278_v10 = vld [vmem:[#allocation2 + $0xac] sm:$0xf]  ;;  %v3222_v44 = vor.u32 %v4338_v37, %v3219_v22  ;;  %v3331_v55 = vld [vmem:[#allocation2 + $0x378] sm:$0xf0] }
  0xc6   :  { %1927 = vmatpush.bf16.msrb.mxu2 %v3698_v11  ;;  %v2979_v11 = vld [vmem:[#allocation2 + $0xb8] sm:$0xf0]  ;;  %v2950_v57 = vor.u32 %v4270_v45, %v2947_v46  ;;  %v4362_v29 = vld [vmem:[#allocation2 + $0x34c] sm:$0xf] }
  0xc7   :  { %1940 = vmatpush.bf16.msrb.mxu3 %v3826_v16  ;;  %v3235_v16 = vld [vmem:[#allocation2 + $0x2b8] sm:$0xf0]  ;;  %v2982_v25 = vor.u32 %v4278_v10, %v2979_v11  ;;  %v4262_v10 = vld [vmem:[#allocation2 + $0x2c] sm:$0xf] }
  0xc8   :  { %1902 = vmatpush.bf16.msrb.mxu0 %v3426_v27  ;;  %v3110_v27 = vor.u32 %v4310_v38, %v3107_v14  ;;  %v3238_v28 = vor.u32 %v4342_v15, %v3235_v16  ;;  %v3059_v1 = vld [vmem:[#allocation2 + $0x158] sm:$0xf0]  ;;  %v4294_v38 = vld [vmem:[#allocation2 + $0x12c] sm:$0xf] }
  0xc9   :  { %1915 = vmatpush.bf16.msrb.mxu1 %v3554_v33  ;;  %v2963_v33 = vld [vmem:[#allocation2 + $0x98] sm:$0xf0]  ;;  %v4326_v16 = vld [vmem:[#allocation2 + $0x22c] sm:$0xf] }
  0xca   :  { %1928 = vmatpush.bf16.msrb.mxu2 %v3682_v34  ;;  %v1673_v7 = vpop.f32.mrf.mxu2  ;;  %v1686_v31 = vpop.f32.mrf.mxu3  ;;  %v4306_v34 = vld [vmem:[#allocation2 + $0x18c] sm:$0xf]  ;;  %v2966_v42 = vor.u32 %v4274_v30, %v2963_v33  ;;  %v3187_v3 = vld [vmem:[#allocation2 + $0x258] sm:$0xf0] }
  0xcb   :  { %1941 = vmatpush.bf16.msrb.mxu3 %v3810_v40  ;;  %v4370_v40 = vld [vmem:[#allocation2 + $0x38c] sm:$0xf]  ;;  %v3094_v43 = vor.u32 %v4306_v34, %v3091_v36  ;;  %v3315_v6 = vld [vmem:[#allocation2 + $0x358] sm:$0xf0] }
  0xcc   :  { %1903 = vmatpush.bf16.msrb.mxu0 %v3410_v48  ;;  %v1697_v20 = vpop.f32.mrf.mxu0  ;;  %v3350_v50 = vor.u32 %v4370_v40, %v3347_v41  ;;  %v2915_v11 = vld [vmem:[#allocation2 + $0x38] sm:$0xf0]  ;;  %v3318_v14 = vor.u32 %v4362_v29, %v3315_v6  ;;  %v4358_v23 = vld [vmem:[#allocation2 + $0x32c] sm:$0xf] }
  0xcd   :  { %1916 = vmatpush.bf16.msrb.mxu1 %v3538_v53  ;;  %v1698_v48 = vadd.f32 %v1697_v20, %v4798_v26  ;;  %v1710_v49 = vpop.f32.mrf.mxu1  ;;  %v3203_v53 = vld [vmem:[#allocation2 + $0x278] sm:$0xf0]  ;;  %v4322_v37 = vld [vmem:[#allocation2 + $0x20c] sm:$0xf] }
  0xce   :  { %1929 = vmatpush.bf16.msrb.mxu2 %v3666_v54  ;;  %v4366_v54 = vld [vmem:[#allocation2 + $0x36c] sm:$0xf]  ;;  %v3043_v15 = vld [vmem:[#allocation2 + $0x138] sm:$0xf0] }
  0xcf   :  { %1942 = vmatpush.bf16.msrb.mxu3 %v3794_v58  ;;  %1904 = vmatmul.bf16.vlgmr.msrb.gmra.mxu0 %v4803_v17  ;;  %v1711_v56 = vadd.f32 %v1710_v49, %v1698_v48  ;;  %v3078_v58 = vor.u32 %v4302_v47, %v3075_v51  ;;  %v3334_v26 = vor.u32 %v4366_v54, %v3331_v55  ;;  %v3171_v19 = vld [vmem:[#allocation2 + $0x238] sm:$0xf0]  ;;  %v4446_v46 = vld [vmem:[#allocation2 + $0x5ec] sm:$0xf] }
  0xd0   :  { %1948 = vmatpush.bf16.msra.mxu0 %v3014_v60  ;;  %1917 = vmatmul.bf16.vlgmr.msrb.gmra.mxu1 %v4809_v24  ;;  %v3206_v60 = vor.u32 %v4334_v52, %v3203_v53  ;;  %v2899_v30 = vld [vmem:[#allocation2 + $0x18] sm:$0xf0]  ;;  %v3046_v33 = vor.u32 %v4294_v38, %v3043_v15  ;;  %v3174_v34 = vor.u32 %v4326_v16, %v3171_v19  ;;  %v4478_v49 = vld [vmem:[#allocation2 + $0x6ec] sm:$0xf]  ;;  %v4623_v16 = vld [vmem:[#allocation1 + $0x9] sm:$0xff] }
  0xd1   :  { %1961 = vmatpush.bf16.msra.mxu1 %v3142_v61  ;;  %1930 = vmatmul.bf16.vlgmr.msrb.gmra.mxu2 %v4800_v12  ;;  %v4266_v61 = vld [vmem:[#allocation2 + $0x4c] sm:$0xf]  ;;  %v3027_v36 = vld [vmem:[#allocation2 + $0x118] sm:$0xf0] }
  0xd2   :  { %1974 = vmatpush.bf16.msra.mxu2 %v3270_v62  ;;  %1943 = vmatmul.bf16.vlgmr.msrb.gmra.mxu3 %v4806_v18  ;;  %v2931_v62 = vld [vmem:[#allocation2 + $0x58] sm:$0xf0]  ;;  %v4510_v53 = vld [vmem:[#allocation2 + $0x7ec] sm:$0xf] }
  0xd3   :  { %1987 = vmatpush.bf16.msra.mxu3 %v3398_v2  ;;  %v4330_v2 = vld [vmem:[#allocation2 + $0x24c] sm:$0xf]  ;;  %v2934_v7 = vor.u32 %v4266_v61, %v2931_v62  ;;  %v3155_v41 = vld [vmem:[#allocation2 + $0x218] sm:$0xf0] }
  0xd4   :  { %1949 = vmatpush.bf16.msra.mxu0 %v2998_v8  ;;  %v1723_v0 = vpop.f32.mrf.mxu2  ;;  %v1699_v31 = vpop.f32.mrf.mxu0  ;;  %v3283_v20 = vld [vmem:[#allocation2 + $0x318] sm:$0xf0]  ;;  %v3158_v52 = vor.u32 %v4322_v37, %v3155_v41  ;;  %v4442_v62 = vld [vmem:[#allocation2 + $0x5cc] sm:$0xf] }
  0xd5   :  { %1962 = vmatpush.bf16.msra.mxu1 %v3126_v9  ;;  %v1724_v4 = vadd.f32 %v1723_v0, %v1711_v56  ;;  %v1736_v5 = vpop.f32.mrf.mxu3  ;;  %v3062_v9 = vor.u32 %v4298_v63, %v3059_v1  ;;  %v3523_v45 = vld [vmem:[#allocation2 + $0x4f8] sm:$0xf0]  ;;  %v4406_v6 = vld [vmem:[#allocation2 + $0x4ac] sm:$0xf] }
  0xd6   :  { %1975 = vmatpush.bf16.msra.mxu2 %v3254_v32  ;;  %v3190_v32 = vor.u32 %v4330_v2, %v3187_v3  ;;  %v3651_v48 = vld [vmem:[#allocation2 + $0x5f8] sm:$0xf0]  ;;  %v4506_v2 = vld [vmem:[#allocation2 + $0x7cc] sm:$0xf] }
  0xd7   :  { %1988 = vmatpush.bf16.msra.mxu3 %v3382_v13  ;;  %v4813_v8 = vadd.f32 %v1736_v5, %v1724_v4  ;;  %v1712_v13 = vpop.f32.mrf.mxu1  ;;  %v3907_v54 = vld [vmem:[#allocation2 + $0x7f8] sm:$0xf0]  ;;  %v4438_v31 = vld [vmem:[#allocation2 + $0x5ac] sm:$0xf] }
  0xd8   :  { %1950 = vmatpush.bf16.msra.mxu0 %v2982_v25  ;;  %v3299_v25 = vld [vmem:[#allocation2 + $0x338] sm:$0xf0]  ;;  %v3910_v63 = vor.u32 %v4510_v53, %v3907_v54  ;;  %v4502_v13 = vld [vmem:[#allocation2 + $0x7ac] sm:$0xf] }
  0xd9   :  { %1963 = vmatpush.bf16.msra.mxu1 %v3110_v27  ;;  %v2918_v27 = vor.u32 %v4262_v10, %v2915_v11  ;;  %v3302_v40 = vor.u32 %v4358_v23, %v3299_v25  ;;  %v3507_v61 = vld [vmem:[#allocation2 + $0x4d8] sm:$0xf0]  ;;  %v4470_v11 = vld [vmem:[#allocation2 + $0x6ac] sm:$0xf]  ;;  %vm2052_vm1 = vcmp.ge.f32.partialorder %v4813_v8, 0.0 }
  0xda   :  { %1976 = vmatpush.bf16.msra.mxu2 %v3238_v28  ;;  %v4258_v28 = vld [vmem:[#allocation2 + $0xc] sm:$0xf]  ;;  %v3635_v0 = vld [vmem:[#allocation2 + $0x5d8] sm:$0xf0] }
  0xdb   :  { %1989 = vmatpush.bf16.msra.mxu3 %v3366_v35  ;;  %v4290_v35 = vld [vmem:[#allocation2 + $0x10c] sm:$0xf]  ;;  %v2902_v47 = vor.u32 %v4258_v28, %v2899_v30  ;;  %v3763_v1 = vld [vmem:[#allocation2 + $0x6d8] sm:$0xf0]  ;;  %v3638_v5 = vor.u32 %v4442_v62, %v3635_v0 }
  0xdc   :  { %1951 = vmatpush.bf16.msra.mxu0 %v2966_v42  ;;  %v1725_v22 = vpop.f32.mrf.mxu2  ;;  %v4354_v42 = vld [vmem:[#allocation2 + $0x30c] sm:$0xf]  ;;  %v3030_v51 = vor.u32 %v4290_v35, %v3027_v36  ;;  %v3891_v3 = vld [vmem:[#allocation2 + $0x7d8] sm:$0xf0] }
  0xdd   :  { %1964 = vmatpush.bf16.msra.mxu1 %v3094_v43  ;;  %v1738_v43 = vpop.f32.mrf.mxu3  ;;  %v3286_v55 = vor.u32 %v4354_v42, %v3283_v20  ;;  %v3619_v10 = vld [vmem:[#allocation2 + $0x5b8] sm:$0xf0]  ;;  %v4402_v25 = vld [vmem:[#allocation2 + $0x48c] sm:$0xf] }
  0xde   :  { %1977 = vmatpush.bf16.msra.mxu2 %v3222_v44  ;;  %v4414_v44 = vld [vmem:[#allocation2 + $0x4ec] sm:$0xf]  ;;  %v3747_v38 = vld [vmem:[#allocation2 + $0x6b8] sm:$0xf0]  ;;  %v3622_v19 = vor.u32 %v4438_v31, %v3619_v10 }
  0xdf   :  { %1990 = vmatpush.bf16.msra.mxu3 %v3350_v50  ;;  %v3779_v50 = vld [vmem:[#allocation2 + $0x6f8] sm:$0xf0]  ;;  %v3526_v56 = vor.u32 %v4414_v44, %v3523_v45  ;;  %v3750_v23 = vor.u32 %v4470_v11, %v3747_v38  ;;  %v4434_v28 = vld [vmem:[#allocation2 + $0x58c] sm:$0xf]  ;;  %v331_v38 = vperm.slane %v4795_v59, 1 }
  0xe0   :  { %1952 = vmatpush.bf16.msra.mxu0 %v2950_v57  ;;  %v3654_v57 = vor.u32 %v4446_v46, %v3651_v48  ;;  %v3731_v35 = vld [vmem:[#allocation2 + $0x698] sm:$0xf0]  ;;  %v4498_v36 = vld [vmem:[#allocation2 + $0x78c] sm:$0xf]  ;;  %v4528_v59 = vld [vmem:[#allocation4 + $0x74] sm:$0xf0] }
  0xe1   :  { %1965 = vmatpush.bf16.msra.mxu1 %v3078_v58  ;;  %v3782_v58 = vor.u32 %v4478_v49, %v3779_v50  ;;  %v4398_v41 = vld [vmem:[#allocation2 + $0x46c] sm:$0xf]  ;;  %v3459_v42 = vld [vmem:[#allocation2 + $0x478] sm:$0xf0] }
  0xe2   :  { %1978 = vmatpush.bf16.msra.mxu2 %v3206_v60  ;;  %v4410_v60 = vld [vmem:[#allocation2 + $0x4cc] sm:$0xf]  ;;  %v3587_v45 = vld [vmem:[#allocation2 + $0x578] sm:$0xf0]  ;;  %v3462_v50 = vor.u32 %v4398_v41, %v3459_v42  ;;  %v4544_v41 = vld [vmem:[#allocation4 + $0xf4] sm:$0xf0] }
  0xe3   :  { %1991 = vmatpush.bf16.msra.mxu3 %v3334_v26  ;;  %v4474_v26 = vld [vmem:[#allocation2 + $0x6cc] sm:$0xf]  ;;  %v3510_v4 = vor.u32 %v4410_v60, %v3507_v61  ;;  %v3843_v49 = vld [vmem:[#allocation2 + $0x778] sm:$0xf0] }
  0xe4   :  { %1953 = vmatpush.bf16.msra.mxu0 %v2934_v7  ;;  %v3766_v29 = vor.u32 %v4474_v26, %v3763_v1  ;;  %v3491_v7 = vld [vmem:[#allocation2 + $0x4b8] sm:$0xf0]  ;;  %v4430_v20 = vld [vmem:[#allocation2 + $0x56c] sm:$0xf] }
  0xe5   :  { %1966 = vmatpush.bf16.msra.mxu1 %v3062_v9  ;;  %v3894_v9 = vor.u32 %v4506_v2, %v3891_v3  ;;  %v3494_v15 = vor.u32 %v4406_v6, %v3491_v7  ;;  %v4462_v46 = vld [vmem:[#allocation2 + $0x66c] sm:$0xf]  ;;  %v3443_v54 = vld [vmem:[#allocation2 + $0x458] sm:$0xf0] }
  0xe6   :  { %1979 = vmatpush.bf16.msra.mxu2 %v3190_v32  ;;  %v4622_v32 = vld [vmem:[#allocation1 + $0x12] sm:$0xff]  ;;  %v3699_v61 = vld [vmem:[#allocation2 + $0x658] sm:$0xf0] }
  0xe7   :  { %1992 = vmatpush.bf16.msra.mxu3 %v3318_v14  ;;  %v3875_v14 = vld [vmem:[#allocation2 + $0x7b8] sm:$0xf0]  ;;  %v4494_v48 = vld [vmem:[#allocation2 + $0x76c] sm:$0xf] }
  0xe8   :  { %1954 = vmatpush.bf16.msra.mxu0 %v2918_v27  ;;  %v3475_v27 = vld [vmem:[#allocation2 + $0x498] sm:$0xf0]  ;;  %v3878_v30 = vor.u32 %v4502_v13, %v3875_v14  ;;  %v4394_v53 = vld [vmem:[#allocation2 + $0x44c] sm:$0xf] }
  0xe9   :  { %1967 = vmatpush.bf16.msra.mxu1 %v3046_v33  ;;  %v3603_v33 = vld [vmem:[#allocation2 + $0x598] sm:$0xf0]  ;;  %v4458_v60 = vld [vmem:[#allocation2 + $0x64c] sm:$0xf]  ;;  %v3446_v26 = vor.u32 %v4394_v53, %v3443_v54  ;;  %v3953_v54 = vld [vmem:[#allocation4 + $0x50] sm:$0xf] }
  0xea   :  { %1980 = vmatpush.bf16.msra.mxu2 %v3174_v34  ;;  %v4466_v34 = vld [vmem:[#allocation2 + $0x68c] sm:$0xf]  ;;  %v3606_v22 = vor.u32 %v4434_v28, %v3603_v33  ;;  %v3827_v0 = vld [vmem:[#allocation2 + $0x758] sm:$0xf0]  ;;  %v3702_v3 = vor.u32 %v4458_v60, %v3699_v61 }
  0xeb   :  { %1993 = vmatpush.bf16.msra.mxu3 %v3302_v40  ;;  %v3734_v40 = vor.u32 %v4466_v34, %v3731_v35  ;;  %v3555_v31 = vld [vmem:[#allocation2 + $0x538] sm:$0xf0]  ;;  %v4486_v10 = vld [vmem:[#allocation2 + $0x72c] sm:$0xf] }
  0xec   :  { %1955 = vmatpush.bf16.msra.mxu0 %v2902_v47  ;;  %v4817_v37 = vpop.f32.mrf.mxu0  ;;  %v3715_v47 = vld [vmem:[#allocation2 + $0x678] sm:$0xf0]  ;;  %v4386_v14 = vld [vmem:[#allocation2 + $0x40c] sm:$0xf] }
  0xed   :  { %1968 = vmatpush.bf16.msra.mxu1 %v3030_v51  ;;  %v4819_v43 = vpop.f32.mrf.mxu1  ;;  %v3590_v51 = vor.u32 %v4430_v20, %v3587_v45  ;;  %v3811_v11 = vld [vmem:[#allocation2 + $0x738] sm:$0xf0]  ;;  %v4482_v34 = vld [vmem:[#allocation2 + $0x70c] sm:$0xf] }
  0xee   :  { %1981 = vmatpush.bf16.msra.mxu2 %v3158_v52  ;;  %v3718_v52 = vor.u32 %v4462_v46, %v3715_v47  ;;  %v3814_v28 = vor.u32 %v4486_v10, %v3811_v11  ;;  %v3667_v33 = vld [vmem:[#allocation2 + $0x618] sm:$0xf0] }
  0xef   :  { %1994 = vmatpush.bf16.msra.mxu3 %v3286_v55  ;;  %1956 = vmatmul.bf16.vlgmr.msra.gmra.mxu0 %v4785_v39  ;;  %v3859_v39 = vld [vmem:[#allocation2 + $0x798] sm:$0xf0]  ;;  %v4426_v55 = vld [vmem:[#allocation2 + $0x54c] sm:$0xf] }
  0xf0   :  { %2000 = vmatpush.bf16.msrb.mxu0 %v3526_v56  ;;  %1969 = vmatmul.bf16.vlgmr.msra.gmra.mxu1 %v4623_v16  ;;  %v3862_v44 = vor.u32 %v4498_v36, %v3859_v39  ;;  %v3795_v36 = vld [vmem:[#allocation2 + $0x718] sm:$0xf0]  ;;  %v3969_v39 = vld [vmem:[#allocation4 + $0x70] sm:$0xf] }
  0xf1   :  { %2013 = vmatpush.bf16.msrb.mxu1 %v3654_v57  ;;  %1982 = vmatmul.bf16.vlgmr.msra.gmra.mxu2 %v4622_v32  ;;  %v3846_v57 = vor.u32 %v4494_v48, %v3843_v49  ;;  %v3683_v32 = vld [vmem:[#allocation2 + $0x638] sm:$0xf0]  ;;  %v3970_v45 = vor.u32 %v4528_v59, %v3969_v39  ;;  %v3961_v48 = vld [vmem:[#allocation4 + $0x60] sm:$0xf]  ;;  %v4526_v49 = vld [vmem:[#allocation4 + $0x64] sm:$0xf0] }
  0xf2   :  { %2026 = vmatpush.bf16.msrb.mxu2 %v3782_v58  ;;  %1995 = vmatmul.bf16.vlgmr.msra.gmra.mxu3 %v4788_v21  ;;  %v3478_v21 = vor.u32 %v4402_v25, %v3475_v27  ;;  %v3571_v58 = vld [vmem:[#allocation2 + $0x558] sm:$0xf0]  ;;  %v4516_v39 = vld [vmem:[#allocation4 + $0x14] sm:$0xf0] }
  0xf3   :  { %2039 = vmatpush.bf16.msrb.mxu3 %v3910_v63  ;;  %v4490_v63 = vld [vmem:[#allocation2 + $0x74c] sm:$0xf]  ;;  %v3574_v2 = vor.u32 %v4426_v55, %v3571_v58  ;;  %v3539_v25 = vld [vmem:[#allocation2 + $0x518] sm:$0xf0]  ;;  %v4524_v55 = vld [vmem:[#allocation4 + $0x54] sm:$0xf0] }
  0xf4   :  { %2001 = vmatpush.bf16.msrb.mxu0 %v3510_v4  ;;  %v4821_v56 = vpop.f32.mrf.mxu2  ;;  %v1751_v1 = vpop.f32.mrf.mxu0  ;;  %v4390_v4 = vld [vmem:[#allocation2 + $0x42c] sm:$0xf]  ;;  %v3830_v7 = vor.u32 %v4490_v63, %v3827_v0  ;;  %v3954_v58 = vor.u32 %v4524_v55, %v3953_v54  ;;  %v4522_v63 = vld [vmem:[#allocation4 + $0x44] sm:$0xf0]  ;;  %v4009_v0 = vld [vmem:[#allocation4 + $0xc0] sm:$0xf] }
  0xf5   :  { %2014 = vmatpush.bf16.msrb.mxu1 %v3638_v5  ;;  %v4823_v62 = vpop.f32.mrf.mxu3  ;;  %v3427_v5 = vld [vmem:[#allocation2 + $0x438] sm:$0xf0]  ;;  %v1764_v6 = vpop.f32.mrf.mxu1  ;;  %v4560_v1 = vld [vmem:[#allocation4 + $0x174] sm:$0xf0]  ;;  %v4065_v54 = vld [vmem:[#allocation4 + $0x130] sm:$0xf] }
  0xf6   :  { %2027 = vmatpush.bf16.msrb.mxu2 %v3766_v29  ;;  %v4422_v29 = vld [vmem:[#allocation2 + $0x52c] sm:$0xf]  ;;  %v3430_v13 = vor.u32 %v4390_v4, %v3427_v5  ;;  %v3937_v4 = vld [vmem:[#allocation4 + $0x30] sm:$0xf]  ;;  %v4552_v55 = vld [vmem:[#allocation4 + $0x134] sm:$0xf0] }
  0xf7   :  { %2040 = vmatpush.bf16.msrb.mxu3 %v3894_v9  ;;  %v4454_v9 = vld [vmem:[#allocation2 + $0x62c] sm:$0xf]  ;;  %v4001_v5 = vld [vmem:[#allocation4 + $0xb0] sm:$0xf] }
  0xf8   :  { %2002 = vmatpush.bf16.msrb.mxu0 %v3494_v15  ;;  %v3558_v15 = vor.u32 %v4422_v29, %v3555_v31  ;;  %v3686_v16 = vor.u32 %v4454_v9, %v3683_v32  ;;  %v4558_v31 = vld [vmem:[#allocation4 + $0x164] sm:$0xf0] }
  0xf9   :  { %2015 = vmatpush.bf16.msrb.mxu1 %v3622_v19  ;;  %v3411_v19 = vld [vmem:[#allocation2 + $0x418] sm:$0xf0] }
  0xfa   :  { %2028 = vmatpush.bf16.msrb.mxu2 %v3750_v23  ;;  %v4418_v23 = vld [vmem:[#allocation2 + $0x50c] sm:$0xf] }
  0xfb   :  { %2041 = vmatpush.bf16.msrb.mxu3 %v3878_v30  ;;  %v4450_v30 = vld [vmem:[#allocation2 + $0x60c] sm:$0xf]  ;;  %v3542_v42 = vor.u32 %v4418_v23, %v3539_v25  ;;  %v4081_v25 = vld [vmem:[#allocation4 + $0x150] sm:$0xf] }
  0xfc   :  { %2003 = vmatpush.bf16.msrb.mxu0 %v3478_v21  ;;  %v1777_v27 = vpop.f32.mrf.mxu2  ;;  %v1750_v21 = vadd.f32 %v4817_v37, %v331_v38  ;;  %v3670_v20 = vor.u32 %v4450_v30, %v3667_v33  ;;  %v3962_v37 = vor.u32 %v4526_v49, %v3961_v48  ;;  %v3929_v38 = vld [vmem:[#allocation4 + $0x20] sm:$0xf] }
  0xfd   :  { %2016 = vmatpush.bf16.msrb.mxu1 %v3606_v22  ;;  %v1790_v35 = vpop.f32.mrf.mxu3  ;;  %v3414_v22 = vor.u32 %v4386_v14, %v3411_v19  ;;  %v3993_v14 = vld [vmem:[#allocation4 + $0xa0] sm:$0xf]  ;;  %v4556_v27 = vld [vmem:[#allocation4 + $0x154] sm:$0xf0] }
  0xfe   :  { %2029 = vmatpush.bf16.msrb.mxu2 %v3734_v40  ;;  %v4033_v40 = vld [vmem:[#allocation4 + $0xf0] sm:$0xf]  ;;  %v1763_v47 = vadd.f32 %v4819_v43, %v1750_v21 }
  0xff   :  { %2042 = vmatpush.bf16.msrb.mxu3 %v3862_v44  ;;  %v3798_v44 = vor.u32 %v4482_v34, %v3795_v36  ;;  %v4034_v46 = vor.u32 %v4544_v41, %v4033_v40  ;;  %v4017_v43 = vld [vmem:[#allocation4 + $0xd0] sm:$0xf]  ;;  %v4073_v40 = vld [vmem:[#allocation4 + $0x140] sm:$0xf]  ;;  %v2056_v41 = vmul.f32 0.01, %v4813_v8 }
 0x100   :  { %2004 = vmatpush.bf16.msrb.mxu0 %v3462_v50  ;;  %v4025_v50 = vld [vmem:[#allocation4 + $0xe0] sm:$0xf]  ;;  %v1776_v53 = vadd.f32 %v4821_v56, %v1763_v47  ;;  %v4538_v56 = vld [vmem:[#allocation4 + $0xc4] sm:$0xf0]  ;;  %v3921_v36 = vld [vmem:[#allocation4 + $0x10] sm:$0xf] }
 0x101   :  { %2017 = vmatpush.bf16.msrb.mxu1 %v3590_v51  ;;  %v4542_v51 = vld [vmem:[#allocation4 + $0xe4] sm:$0xf0]  ;;  %v3985_v21 = vld [vmem:[#allocation4 + $0x90] sm:$0xf] }
 0x102   :  { %2030 = vmatpush.bf16.msrb.mxu2 %v3718_v52  ;;  %v4026_v52 = vor.u32 %v4542_v51, %v4025_v50  ;;  %v1789_v60 = vadd.f32 %v4823_v62, %v1776_v53  ;;  %v4536_v62 = vld [vmem:[#allocation4 + $0xb4] sm:$0xf0]  ;;  %v4530_v47 = vld [vmem:[#allocation4 + $0x84] sm:$0xf0]  ;;  %v4527_v51 = vld [vmem:[#allocation4 + $0x74] sm:$0xf] }
 0x103   :  { %2043 = vmatpush.bf16.msrb.mxu3 %v3846_v57  ;;  %v4540_v57 = vld [vmem:[#allocation4 + $0xd4] sm:$0xf0]  ;;  %v4002_v11 = vor.u32 %v4536_v62, %v4001_v5 }
 0x104   :  { %2005 = vmatpush.bf16.msrb.mxu0 %v3446_v26  ;;  %v4018_v61 = vor.u32 %v4540_v57, %v4017_v43  ;;  %v4097_v26 = vld [vmem:[#allocation4 + $0x170] sm:$0xf]  ;;  %v4543_v43 = vld [vmem:[#allocation4 + $0xf4] sm:$0xf]  ;;  %v4035_v57 = vld [vmem:[#allocation4 + $0xf8] sm:$0xf0] }
 0x105   :  { %2018 = vmatpush.bf16.msrb.mxu1 %v3574_v2  ;;  %v4098_v2 = vor.u32 %v4560_v1, %v4097_v26  ;;  %v4525_v26 = vld [vmem:[#allocation4 + $0x64] sm:$0xf]  ;;  %v3963_v1 = vld [vmem:[#allocation4 + $0x68] sm:$0xf0]  ;;  %v4548_v62 = vld [vmem:[#allocation4 + $0x114] sm:$0xf0] }
 0x106   :  { %2031 = vmatpush.bf16.msrb.mxu2 %v3702_v3  ;;  %v4010_v3 = vor.u32 %v4538_v56, %v4009_v0  ;;  %v2060_v0 = vsel %vm2052_vm1, %v4813_v8, %v2056_v41  ;;  %v4038_v56 = vor.u32 %v4543_v43, %v4035_v57  ;;  %v4091_v41 = vld [vmem:[#allocation4 + $0x168] sm:$0xf0]  ;;  %v3923_v43 = vld [vmem:[#allocation4 + $0x18] sm:$0xf0] }
 0x107   :  { %2044 = vmatpush.bf16.msrb.mxu3 %v3830_v7  ;;  %v4089_v7 = vld [vmem:[#allocation4 + $0x160] sm:$0xf]  ;;  %v4839_v5 = vpack.c.bf16 %v2060_v0, %v2060_v0 }
 0x108   :  { %2006 = vmatpush.bf16.msrb.mxu0 %v3430_v13  ;;  %v4090_v32 = vor.u32 %v4558_v31, %v4089_v7  ;;  %v4518_v13 = vld [vmem:[#allocation4 + $0x24] sm:$0xf0]  ;;  %v4523_v7 = vld [vmem:[#allocation4 + $0x54] sm:$0xf]  ;;  %v3955_v31 = vld [vmem:[#allocation4 + $0x58] sm:$0xf0] }
 0x109   :  { %2019 = vmatpush.bf16.msrb.mxu1 %v3558_v15  ;;  %v3930_v30 = vor.u32 %v4518_v13, %v3929_v38  ;;  %v4546_v38 = vld [vmem:[#allocation4 + $0x104] sm:$0xf0]  ;;  %v4559_v13 = vld [vmem:[#allocation4 + $0x174] sm:$0xf] }
 0x10a   :  { %2032 = vmatpush.bf16.msrb.mxu2 %v3686_v16  ;;  %v4534_v16 = vld [vmem:[#allocation4 + $0xa4] sm:$0xf0] }
 0x10b   :  { %2045 = vmatpush.bf16.msrb.mxu3 %v3814_v28  ;;  %v4082_v28 = vor.u32 %v4556_v27, %v4081_v25  ;;  %v3994_v34 = vor.u32 %v4534_v16, %v3993_v14  ;;  %v4099_v14 = vld [vmem:[#allocation4 + $0x178] sm:$0xf0]  ;;  %v4537_v27 = vld [vmem:[#allocation4 + $0xc4] sm:$0xf] }
 0x10c   :  { %2007 = vmatpush.bf16.msrb.mxu0 %v3414_v22  ;;  %v4532_v22 = vld [vmem:[#allocation4 + $0x94] sm:$0xf0] }
 0x10d   :  { %2020 = vmatpush.bf16.msrb.mxu1 %v3542_v42  ;;  %v1814_v6 = vpop.f32.mrf.mxu1  ;;  %v3913_v42 = vld [vmem:[#allocation4] sm:$0xf]  ;;  %v3986_v50 = vor.u32 %v4532_v22, %v3985_v21  ;;  %v4003_v21 = vld [vmem:[#allocation4 + $0xb8] sm:$0xf0] }
 0x10e   :  { %2033 = vmatpush.bf16.msrb.mxu2 %v3670_v20  ;;  %v4554_v20 = vld [vmem:[#allocation4 + $0x144] sm:$0xf0] }
 0x10f   :  { %2046 = vmatpush.bf16.msrb.mxu3 %v3798_v44  ;;  %2008 = vmatmul.bf16.vlgmr.msrb.gmra.mxu0 %v4803_v17  ;;  %v3945_v17 = vld [vmem:[#allocation4 + $0x40] sm:$0xf]  ;;  %v3922_v44 = vor.u32 %v4516_v39, %v3921_v36  ;;  %v4074_v48 = vor.u32 %v4554_v20, %v4073_v40  ;;  %v3939_v36 = vld [vmem:[#allocation4 + $0x38] sm:$0xf0]  ;;  %v4535_v39 = vld [vmem:[#allocation4 + $0xb4] sm:$0xf] }
 0x110   :  { %2458 = vmatpush.bf16.msra.mxu0 %v3970_v45  ;;  %2021 = vmatmul.bf16.vlgmr.msrb.gmra.mxu1 %v4809_v24  ;;  %v3946_v24 = vor.u32 %v4522_v63, %v3945_v17  ;;  %v4514_v45 = vld [vmem:[#allocation4 + $0x4] sm:$0xf0]  ;;  %v4557_v40 = vld [vmem:[#allocation4 + $0x164] sm:$0xf] }
 0x111   :  { %2471 = vmatpush.bf16.msra.mxu1 %v4034_v46  ;;  %2034 = vmatmul.bf16.vlgmr.msrb.gmra.mxu2 %v4800_v12  ;;  %v1801_v12 = vpop.f32.mrf.mxu0  ;;  %v3977_v46 = vld [vmem:[#allocation4 + $0x80] sm:$0xf] }
 0x112   :  { %2047 = vmatmul.bf16.vlgmr.msrb.gmra.mxu3 %v4806_v18  ;;  %v4520_v18 = vld [vmem:[#allocation4 + $0x34] sm:$0xf0]  ;;  %v1802_v29 = vadd.f32 %v1801_v12, %v1789_v60  ;;  %2484 = vmatpush.bf16.msra.mxu2 %v4098_v2  ;;  %v3914_v60 = vor.u32 %v4514_v45, %v3913_v42  ;;  %v3978_v17 = vor.u32 %v4530_v47, %v3977_v46  ;;  %v4541_v2 = vld [vmem:[#allocation4 + $0xe4] sm:$0xf]  ;;  %v4057_v12 = vld [vmem:[#allocation4 + $0x120] sm:$0xf] }
 0x113   :  { %v3938_v10 = vor.u32 %v4520_v18, %v3937_v4  ;;  %v4094_v42 = vor.u32 %v4557_v40, %v4091_v41  ;;  %v4517_v45 = vld [vmem:[#allocation4 + $0x24] sm:$0xf]  ;;  %v3931_v46 = vld [vmem:[#allocation4 + $0x28] sm:$0xf0]  ;;  %v4145_v40 = vld [vmem:[#allocation4 + $0x1d0] sm:$0xf] }
 0x114   :  { %2459 = vmatpush.bf16.msra.mxu0 %v3962_v37  ;;  %v1815_v9 = vadd.f32 %v1814_v6, %v1802_v29  ;;  %v1827_v15 = vpop.f32.mrf.mxu2  ;;  %v3971_v37 = vld [vmem:[#allocation4 + $0x78] sm:$0xf0]  ;;  %v3966_v29 = vor.u32 %v4525_v26, %v3963_v1  ;;  %v4049_v6 = vld [vmem:[#allocation4 + $0x110] sm:$0xf]  ;;  %v4533_v47 = vld [vmem:[#allocation4 + $0xa4] sm:$0xf] }
 0x115   :  { %2472 = vmatpush.bf16.msra.mxu1 %v4026_v52  ;;  %v1840_v23 = vpop.f32.mrf.mxu3  ;;  %v1816_v59 = vpop.f32.mrf.mxu1  ;;  %v3974_v63 = vor.u32 %v4527_v51, %v3971_v37  ;;  %v4555_v51 = vld [vmem:[#allocation4 + $0x154] sm:$0xf]  ;;  %v4083_v37 = vld [vmem:[#allocation4 + $0x158] sm:$0xf0]  ;;  %v4572_v41 = vld [vmem:[#allocation4 + $0x1d4] sm:$0xf0] }
 0x116   :  { %2485 = vmatpush.bf16.msra.mxu2 %v4090_v32  ;;  %v1828_v19 = vadd.f32 %v1827_v15, %v1815_v9  ;;  %v4539_v9 = vld [vmem:[#allocation4 + $0xd4] sm:$0xf]  ;;  %v4050_v32 = vor.u32 %v4548_v62, %v4049_v6  ;;  %v3958_v15 = vor.u32 %v4523_v7, %v3955_v31  ;;  %v4067_v62 = vld [vmem:[#allocation4 + $0x138] sm:$0xf0]  ;;  %v4549_v31 = vld [vmem:[#allocation4 + $0x124] sm:$0xf] }
 0x117   :  { %v4551_v6 = vld [vmem:[#allocation4 + $0x134] sm:$0xf] }
 0x118   :  { %2460 = vmatpush.bf16.msra.mxu0 %v3954_v58  ;;  %v1841_v35 = vadd.f32 %v1840_v23, %v1828_v19  ;;  %v4066_v58 = vor.u32 %v4552_v55, %v4065_v54  ;;  %v4521_v19 = vld [vmem:[#allocation4 + $0x44] sm:$0xf]  ;;  %v3947_v23 = vld [vmem:[#allocation4 + $0x48] sm:$0xf0]  ;;  %v4515_v55 = vld [vmem:[#allocation4 + $0x14] sm:$0xf]  ;;  %v4070_v7 = vor.u32 %v4551_v6, %v4067_v62 }
 0x119   :  { %2473 = vmatpush.bf16.msra.mxu1 %v4018_v61  ;;  %v1803_v33 = vpop.f32.mrf.mxu0  ;;  %v3926_v0 = vor.u32 %v4515_v55, %v3923_v43  ;;  %v4121_v55 = vld [vmem:[#allocation4 + $0x1a0] sm:$0xf]  ;;  %v4566_v43 = vld [vmem:[#allocation4 + $0x1a4] sm:$0xf0] }
 0x11a   :  { %2486 = vmatpush.bf16.msra.mxu2 %v4082_v28  ;;  %v2057_v49 = vmul.f32 0.01, %v1841_v35  ;;  %vm2053_vm0 = vcmp.ge.f32.partialorder %v1841_v35, 0.0  ;;  %v4011_v28 = vld [vmem:[#allocation4 + $0xc8] sm:$0xf0]  ;;  %v3950_v33 = vor.u32 %v4521_v19, %v3947_v23 }
 0x11b   :  { %v4051_v19 = vld [vmem:[#allocation4 + $0x118] sm:$0xf0] }
 0x11c   :  { %2461 = vmatpush.bf16.msra.mxu0 %v3946_v24  ;;  %v1829_v52 = vpop.f32.mrf.mxu2  ;;  %v2061_v61 = vsel %vm2053_vm0, %v1841_v35, %v2057_v49  ;;  %v4027_v24 = vld [vmem:[#allocation4 + $0xe8] sm:$0xf0]  ;;  %v4519_v35 = vld [vmem:[#allocation4 + $0x34] sm:$0xf] }
 0x11d   :  { %2474 = vmatpush.bf16.msra.mxu1 %v4010_v3  ;;  %v1842_v53 = vpop.f32.mrf.mxu3  ;;  %v4550_v3 = vld [vmem:[#allocation4 + $0x124] sm:$0xf0]  ;;  %v4837_v4 = vpack.c.bf16 %v2061_v61, %v2061_v61  ;;  %v4030_v8 = vor.u32 %v4541_v2, %v4027_v24  ;;  %v3942_v20 = vor.u32 %v4519_v35, %v3939_v36  ;;  %v3934_v52 = vor.u32 %v4517_v45, %v3931_v46  ;;  %v4513_v24 = vld [vmem:[#allocation4 + $0x4] sm:$0xf]  ;;  %v4153_v35 = vld [vmem:[#allocation4 + $0x1e0] sm:$0xf] }
 0x11e   :  { %2487 = vmatpush.bf16.msra.mxu2 %v4074_v48  ;;  %v4058_v18 = vor.u32 %v4550_v3, %v4057_v12  ;;  %v3995_v48 = vld [vmem:[#allocation4 + $0xa8] sm:$0xf0]  ;;  %v4086_v53 = vor.u32 %v4555_v51, %v4083_v37  ;;  %v4529_v3 = vld [vmem:[#allocation4 + $0x84] sm:$0xf]  ;;  %v4574_v36 = vld [vmem:[#allocation4 + $0x1e4] sm:$0xf0] }
 0x11f   :  { %v3998_v54 = vor.u32 %v4533_v47, %v3995_v48  ;;  %v3915_v12 = vld [vmem:[#allocation4 + $0x8] sm:$0xf0]  ;;  %v4570_v46 = vld [vmem:[#allocation4 + $0x1c4] sm:$0xf0]  ;;  %v4129_v48 = vld [vmem:[#allocation4 + $0x1b0] sm:$0xf] }
 0x120   :  { %2462 = vmatpush.bf16.msra.mxu0 %v3938_v10  ;;  %v4019_v10 = vld [vmem:[#allocation4 + $0xd8] sm:$0xf0] }
 0x121   :  { %2475 = vmatpush.bf16.msra.mxu1 %v4002_v11  ;;  %v4041_v11 = vld [vmem:[#allocation4 + $0x100] sm:$0xf]  ;;  %v4022_v16 = vor.u32 %v4539_v9, %v4019_v10  ;;  %v4059_v9 = vld [vmem:[#allocation4 + $0x128] sm:$0xf0]  ;;  %v3918_v10 = vor.u32 %v4513_v24, %v3915_v12  ;;  %v4575_v24 = vld [vmem:[#allocation4 + $0x1f4] sm:$0xf] }
 0x122   :  { %2488 = vmatpush.bf16.msra.mxu2 %v4066_v58  ;;  %v4042_v25 = vor.u32 %v4546_v38, %v4041_v11  ;;  %v4531_v58 = vld [vmem:[#allocation4 + $0x94] sm:$0xf]  ;;  %v4161_v11 = vld [vmem:[#allocation4 + $0x1f0] sm:$0xf]  ;;  %v4163_v12 = vld [vmem:[#allocation4 + $0x1f8] sm:$0xf0] }
 0x124   :  { %2463 = vmatpush.bf16.msra.mxu0 %v3930_v30  ;;  %v4102_v30 = vor.u32 %v4559_v13, %v4099_v14  ;;  %v4576_v13 = vld [vmem:[#allocation4 + $0x1f4] sm:$0xf0]  ;;  %v4062_v14 = vor.u32 %v4549_v31, %v4059_v9  ;;  %v4147_v31 = vld [vmem:[#allocation4 + $0x1d8] sm:$0xf0] }
 0x125   :  { %2476 = vmatpush.bf16.msra.mxu1 %v3994_v34  ;;  %v4014_v34 = vor.u32 %v4537_v27, %v4011_v28  ;;  %v4545_v27 = vld [vmem:[#allocation4 + $0x104] sm:$0xf]  ;;  %v4043_v28 = vld [vmem:[#allocation4 + $0x108] sm:$0xf0] }
 0x126   :  { %2489 = vmatpush.bf16.msra.mxu2 %v4058_v18  ;;  %v3979_v18 = vld [vmem:[#allocation4 + $0x88] sm:$0xf0] }
 0x127   :  { %v3982_v38 = vor.u32 %v4529_v3, %v3979_v18  ;;  %v4166_v3 = vor.u32 %v4575_v24, %v4163_v12  ;;  %v4573_v18 = vld [vmem:[#allocation4 + $0x1e4] sm:$0xf] }
 0x128   :  { %2464 = vmatpush.bf16.msra.mxu0 %v3922_v44  ;;  %v4006_v44 = vor.u32 %v4535_v39, %v4003_v21 }
 0x129   :  { %2477 = vmatpush.bf16.msra.mxu1 %v3986_v50 }
 0x12a   :  { %2490 = vmatpush.bf16.msra.mxu2 %v4050_v32 }
 0x12c   :  { %2465 = vmatpush.bf16.msra.mxu0 %v3914_v60  ;;  %v1853_v59 = vpop.f32.mrf.mxu0  ;;  %v3987_v60 = vld [vmem:[#allocation4 + $0x98] sm:$0xf0] }
 0x12d   :  { %2478 = vmatpush.bf16.msra.mxu1 %v3978_v17  ;;  %v4843_v22 = vpop.f32.mrf.mxu1  ;;  %v4553_v17 = vld [vmem:[#allocation4 + $0x144] sm:$0xf]  ;;  %v3990_v2 = vor.u32 %v4531_v58, %v3987_v60 }
 0x12e   :  { %2491 = vmatpush.bf16.msra.mxu2 %v4042_v25 }
 0x12f   :  { %2466 = vmatmul.bf16.vlgmr.msra.gmra.mxu0 %v4839_v5 }
 0x130   :  { %2510 = vmatpush.bf16.msrb.mxu0 %v3974_v63  ;;  %2479 = vmatmul.bf16.vlgmr.msra.gmra.mxu1 %v4837_v4  ;;  %v4075_v63 = vld [vmem:[#allocation4 + $0x148] sm:$0xf0] }
 0x131   :  { %2523 = vmatpush.bf16.msrb.mxu1 %v4038_v56  ;;  %v4848_v56 = vld [vmem:[%s4952_s6] sm:$0xf]  ;;  %v4078_v1 = vor.u32 %v4553_v17, %v4075_v63  ;;  %v4113_v17 = vld [vmem:[#allocation4 + $0x190] sm:$0xf] }
 0x132   :  { %2536 = vmatpush.bf16.msrb.mxu2 %v4102_v30  ;;  %v332_v26 = vperm.slane %v4848_v56, 2  ;;  %v4564_v63 = vld [vmem:[#allocation4 + $0x194] sm:$0xf0] }
 0x134   :  { %2511 = vmatpush.bf16.msrb.mxu0 %v3966_v29  ;;  %v1879_v49 = vpop.f32.mrf.mxu2  ;;  %v1855_v57 = vpop.f32.mrf.mxu0  ;;  %v1854_v32 = vadd.f32 %v1853_v59, %v332_v26  ;;  %v4154_v59 = vor.u32 %v4574_v36, %v4153_v35  ;;  %v4105_v26 = vld [vmem:[#allocation4 + $0x180] sm:$0xf]  ;;  %v4563_v36 = vld [vmem:[#allocation4 + $0x194] sm:$0xf] }
 0x135   :  { %2524 = vmatpush.bf16.msrb.mxu1 %v4030_v8  ;;  %v1892_v50 = vpop.f32.mrf.mxu3  ;;  %v1868_v61 = vpop.f32.mrf.mxu1 }
 0x136   :  { %2537 = vmatpush.bf16.msrb.mxu2 %v4094_v42  ;;  %v1867_v23 = vadd.f32 %v4843_v22, %v1854_v32  ;;  %v4146_v42 = vor.u32 %v4572_v41, %v4145_v40  ;;  %v4122_v61 = vor.u32 %v4566_v43, %v4121_v55  ;;  %v4561_v40 = vld [vmem:[#allocation4 + $0x184] sm:$0xf]  ;;  %v4107_v41 = vld [vmem:[#allocation4 + $0x188] sm:$0xf0]  ;;  %v2132_v55 = vld [vmem:[%s4953_s7] sm:$0x3] }
 0x137   :  { %v2134_v43 = vperm.slane %v2132_v55, 0 }
 0x138   :  { %2512 = vmatpush.bf16.msrb.mxu0 %v3958_v15  ;;  %v4162_v15 = vor.u32 %v4576_v13, %v4161_v11  ;;  %v1880_v30 = vadd.f32 %v1879_v49, %v1867_v23  ;;  %v4568_v49 = vld [vmem:[#allocation4 + $0x1b4] sm:$0xf0]  ;;  %v4139_v13 = vld [vmem:[#allocation4 + $0x1c8] sm:$0xf0]  ;;  %v4131_v23 = vld [vmem:[#allocation4 + $0x1b8] sm:$0xf0] }
 0x139   :  { %2525 = vmatpush.bf16.msrb.mxu1 %v4022_v16  ;;  %v4547_v16 = vld [vmem:[#allocation4 + $0x114] sm:$0xf] }
 0x13a   :  { %2538 = vmatpush.bf16.msrb.mxu2 %v4086_v53  ;;  %2497 = vmatpush.bf16.msra.mxu3 %v4162_v15  ;;  %v4054_v25 = vor.u32 %v4547_v16, %v4051_v19  ;;  %v4130_v53 = vor.u32 %v4568_v49, %v4129_v48  ;;  %v333_v16 = vperm.slane %v4848_v56, 3  ;;  %v4567_v19 = vld [vmem:[#allocation4 + $0x1b4] sm:$0xf]  ;;  %v4110_v56 = vor.u32 %v4561_v40, %v4107_v41 }
 0x13c   :  { %2513 = vmatpush.bf16.msrb.mxu0 %v3950_v33  ;;  %v1881_v29 = vpop.f32.mrf.mxu2  ;;  %v4046_v33 = vor.u32 %v4545_v27, %v4043_v28  ;;  %v4134_v27 = vor.u32 %v4567_v19, %v4131_v23  ;;  %v4565_v28 = vld [vmem:[#allocation4 + $0x1a4] sm:$0xf]  ;;  %v4588_v19 = vld [vmem:[%s4949_s3 + $0x58] sm:$0xff]  ;;  %v4587_v23 = vld [vmem:[%s4949_s3 + $0x50] sm:$0xff] }
 0x13d   :  { %2526 = vmatpush.bf16.msrb.mxu1 %v4014_v34  ;;  %v1894_v8 = vpop.f32.mrf.mxu3  ;;  %v1893_v34 = vadd.f32 %v1892_v50, %v1880_v30  ;;  %v4155_v29 = vld [vmem:[#allocation4 + $0x1e8] sm:$0xf0] }
 0x13e   :  { %2539 = vmatpush.bf16.msrb.mxu2 %v4078_v1  ;;  %2498 = vmatpush.bf16.msra.mxu3 %v4154_v59  ;;  %v4562_v1 = vld [vmem:[#allocation4 + $0x184] sm:$0xf0]  ;;  %v4158_v62 = vor.u32 %v4573_v18, %v4155_v29  ;;  %v4123_v30 = vld [vmem:[#allocation4 + $0x1a8] sm:$0xf0]  ;;  %v4584_v18 = vld [vmem:[%s4949_s3 + $0x38] sm:$0xff] }
 0x13f   :  { %v4592_v29 = vld [vmem:[%s4949_s3 + $0x78] sm:$0xff] }
 0x140   :  { %2514 = vmatpush.bf16.msrb.mxu0 %v3942_v20 }
 0x141   :  { %2527 = vmatpush.bf16.msrb.mxu1 %v4006_v44 }
 0x142   :  { %2540 = vmatpush.bf16.msrb.mxu2 %v4070_v7  ;;  %2499 = vmatpush.bf16.msra.mxu3 %v4146_v42  ;;  %v4571_v7 = vld [vmem:[#allocation4 + $0x1d4] sm:$0xf] }
 0x143   :  { %v4150_v32 = vor.u32 %v4571_v7, %v4147_v31  ;;  %v4581_v31 = vld [vmem:[%s4949_s3 + $0x20] sm:$0xff] }
 0x144   :  { %2515 = vmatpush.bf16.msrb.mxu0 %v3934_v52 }
 0x145   :  { %2528 = vmatpush.bf16.msrb.mxu1 %v3998_v54 }
 0x146   :  { %2541 = vmatpush.bf16.msrb.mxu2 %v4062_v14 }
 0x148   :  { %2516 = vmatpush.bf16.msrb.mxu0 %v3926_v0  ;;  %v4114_v0 = vor.u32 %v4564_v63, %v4113_v17 }
 0x149   :  { %2529 = vmatpush.bf16.msrb.mxu1 %v3990_v2  ;;  %v4106_v2 = vor.u32 %v4562_v1, %v4105_v26 }
 0x14a   :  { %2542 = vmatpush.bf16.msrb.mxu2 %v4054_v25 }
 0x14c   :  { %2517 = vmatpush.bf16.msrb.mxu0 %v3918_v10  ;;  %v1905_v39 = vpop.f32.mrf.mxu0 }
 0x14d   :  { %2530 = vmatpush.bf16.msrb.mxu1 %v3982_v38  ;;  %v1906_v21 = vadd.f32 %v1905_v39, %v1893_v34  ;;  %v1918_v22 = vpop.f32.mrf.mxu1  ;;  %v4569_v38 = vld [vmem:[#allocation4 + $0x1c4] sm:$0xf]  ;;  %v4126_v34 = vor.u32 %v4565_v28, %v4123_v30  ;;  %v4115_v39 = vld [vmem:[#allocation4 + $0x198] sm:$0xf0] }
 0x14e   :  { %2543 = vmatpush.bf16.msrb.mxu2 %v4046_v33  ;;  %v4142_v15 = vor.u32 %v4569_v38, %v4139_v13  ;;  %v4118_v59 = vor.u32 %v4563_v36, %v4115_v39  ;;  %v4578_v13 = vld [vmem:[%s4949_s3 + $0x8] sm:$0xff] }
 0x14f   :  { %2518 = vmatmul.bf16.vlgmr.msrb.gmra.mxu0 %v4839_v5  ;;  %v1919_v5 = vadd.f32 %v1918_v22, %v1906_v21 }
 0x150   :  { %2531 = vmatmul.bf16.vlgmr.msrb.gmra.mxu1 %v4837_v4  ;;  %v4137_v4 = vld [vmem:[#allocation4 + $0x1c0] sm:$0xf]  ;;  %2702 = vmatpush.bf16.msra.mxu0 %v4584_v18 }
 0x151   :  { %v4138_v47 = vor.u32 %v4570_v46, %v4137_v4  ;;  %2715 = vmatpush.bf16.msra.mxu1 %v4592_v29 }
 0x153   :  { %2500 = vmatpush.bf16.msra.mxu3 %v4138_v47 }
 0x154   :  { %v1931_v20 = vpop.f32.mrf.mxu2  ;;  %v1907_v51 = vpop.f32.mrf.mxu0 }
 0x155   :  { %v1932_v44 = vadd.f32 %v1931_v20, %v1919_v5  ;;  %v1944_v45 = vpop.f32.mrf.mxu3  ;;  %v1920_v37 = vpop.f32.mrf.mxu1 }
 0x157   :  { %v1945_v50 = vadd.f32 %v1944_v45, %v1932_v44  ;;  %2501 = vmatpush.bf16.msra.mxu3 %v4130_v53 }
 0x159   :  { %vm2054_vm2 = vcmp.ge.f32.partialorder %v1945_v50, 0.0  ;;  %v2058_v52 = vmul.f32 0.01, %v1945_v50 }
 0x15b   :  { %v2062_v54 = vsel %vm2054_vm2, %v1945_v50, %v2058_v52  ;;  %2502 = vmatpush.bf16.msra.mxu3 %v4122_v61 }
 0x15c   :  { %v2066_v57 = vpack.c.bf16 %v2062_v54, %v2062_v54  ;;  %v1933_v58 = vpop.f32.mrf.mxu2 }
 0x15d   :  { %v1946_v60 = vpop.f32.mrf.mxu3 }
 0x15e   :  { %2492 = vmatmul.bf16.vlgmr.msra.gmra.mxu2 %v2066_v57 }
 0x15f   :  { %2503 = vmatpush.bf16.msra.mxu3 %v4114_v0  ;;  %v2135_v0 = vperm.slane %v2132_v55, 1  ;;  %v4597_v55 = vld [vmem:[%s4951_s5] sm:$0xff] }
 0x163   :  { %2504 = vmatpush.bf16.msra.mxu3 %v4106_v2 }
 0x167   :  { %2549 = vmatpush.bf16.msrb.mxu3 %v4166_v3 }
 0x16b   :  { %2550 = vmatpush.bf16.msrb.mxu3 %v4158_v62  ;;  %v4591_v62 = vld [vmem:[%s4949_s3 + $0x70] sm:$0xff] }
 0x16c   :  { %v1957_v6 = vpop.f32.mrf.mxu0  ;;  %2716 = vmatpush.bf16.msra.mxu1 %v4591_v62 }
 0x16d   :  { %v1970_v8 = vpop.f32.mrf.mxu1  ;;  %v1958_v35 = vadd.f32 %v1957_v6, %v333_v16  ;;  %v4583_v6 = vld [vmem:[%s4949_s3 + $0x30] sm:$0xff]  ;;  %v4589_v16 = vld [vmem:[%s4949_s3 + $0x60] sm:$0xff] }
 0x16e   :  { %2544 = vmatmul.bf16.vlgmr.msrb.gmra.mxu2 %v2066_v57  ;;  %2703 = vmatpush.bf16.msra.mxu0 %v4583_v6 }
 0x16f   :  { %2551 = vmatpush.bf16.msrb.mxu3 %v4150_v32  ;;  %v1971_v21 = vadd.f32 %v1970_v8, %v1958_v35  ;;  %v4582_v8 = vld [vmem:[%s4949_s3 + $0x28] sm:$0xff] }
 0x172   :  { %2704 = vmatpush.bf16.msra.mxu0 %v4582_v8 }
 0x173   :  { %2552 = vmatpush.bf16.msrb.mxu3 %v4142_v15  ;;  %v4577_v15 = vld [vmem:[%s4949_s3] sm:$0xff] }
 0x174   :  { %v1983_v9 = vpop.f32.mrf.mxu2  ;;  %v1959_v11 = vpop.f32.mrf.mxu0 }
 0x175   :  { %v1996_v10 = vpop.f32.mrf.mxu3  ;;  %v1972_v14 = vpop.f32.mrf.mxu1  ;;  %v1984_v22 = vadd.f32 %v1983_v9, %v1971_v21  ;;  %v4580_v9 = vld [vmem:[%s4949_s3 + $0x18] sm:$0xff] }
 0x176   :  { %2705 = vmatpush.bf16.msra.mxu0 %v4581_v31  ;;  %v4590_v14 = vld [vmem:[%s4949_s3 + $0x68] sm:$0xff] }
 0x177   :  { %2553 = vmatpush.bf16.msrb.mxu3 %v4134_v27  ;;  %v1997_v42 = vadd.f32 %v1996_v10, %v1984_v22  ;;  %v4579_v10 = vld [vmem:[%s4949_s3 + $0x10] sm:$0xff]  ;;  %2717 = vmatpush.bf16.msra.mxu1 %v4590_v14  ;;  %v4585_v27 = vld [vmem:[%s4949_s3 + $0x40] sm:$0xff] }
 0x17a   :  { %2706 = vmatpush.bf16.msra.mxu0 %v4580_v9 }
 0x17b   :  { %2554 = vmatpush.bf16.msrb.mxu3 %v4126_v34  ;;  %2718 = vmatpush.bf16.msra.mxu1 %v4589_v16 }
 0x17c   :  { %v1985_v25 = vpop.f32.mrf.mxu2 }
 0x17d   :  { %v1998_v33 = vpop.f32.mrf.mxu3  ;;  %v4586_v25 = vld [vmem:[%s4949_s3 + $0x48] sm:$0xff] }
 0x17e   :  { %2707 = vmatpush.bf16.msra.mxu0 %v4579_v10 }
 0x17f   :  { %2555 = vmatpush.bf16.msrb.mxu3 %v4118_v59  ;;  %2719 = vmatpush.bf16.msra.mxu1 %v4588_v19 }
 0x182   :  { %2708 = vmatpush.bf16.msra.mxu0 %v4578_v13 }
 0x183   :  { %2556 = vmatpush.bf16.msrb.mxu3 %v4110_v56  ;;  %2720 = vmatpush.bf16.msra.mxu1 %v4587_v23 }
 0x186   :  { %2709 = vmatpush.bf16.msra.mxu0 %v4577_v15 }
 0x187   :  { %2721 = vmatpush.bf16.msra.mxu1 %v4586_v25 }
 0x18b   :  { %2722 = vmatpush.bf16.msra.mxu1 %v4585_v27 }
 0x18c   :  { %v2009_v5 = vpop.f32.mrf.mxu0 }
 0x18d   :  { %v2022_v20 = vpop.f32.mrf.mxu1  ;;  %v2010_v44 = vadd.f32 %v2009_v5, %v1997_v42  ;;  %v4596_v5 = vld [vmem:[%s4950_s4 + $0x18] sm:$0xff] }
 0x18e   :  { %2776 = vmatpush.bf16.msra.mxu2 %v4596_v5 }
 0x18f   :  { %v2023_v45 = vadd.f32 %v2022_v20, %v2010_v44  ;;  %v4595_v20 = vld [vmem:[%s4950_s4 + $0x10] sm:$0xff]  ;;  %v4594_v44 = vld [vmem:[%s4950_s4 + $0x8] sm:$0xff] }
 0x192   :  { %2777 = vmatpush.bf16.msra.mxu2 %v4595_v20 }
 0x194   :  { %v2035_v4 = vpop.f32.mrf.mxu2  ;;  %v2011_v48 = vpop.f32.mrf.mxu0 }
 0x195   :  { %v2036_v46 = vadd.f32 %v2035_v4, %v2023_v45  ;;  %v2048_v47 = vpop.f32.mrf.mxu3  ;;  %v2024_v49 = vpop.f32.mrf.mxu1  ;;  %v4593_v45 = vld [vmem:[%s4950_s4] sm:$0xff]  ;;  %v4598_v4 = vld [vmem:[%s4951_s5 + $0x8] sm:$0xff] }
 0x196   :  { %2778 = vmatpush.bf16.msra.mxu2 %v4594_v44  ;;  %v4605_v48 = vld [vmem:[%s4954_s8] ss:$0 sm:$0xff] }
 0x197   :  { %v2049_v50 = vadd.f32 %v2048_v47, %v2036_v46 }
 0x199   :  { %vm2055_vm3 = vcmp.ge.f32.partialorder %v2049_v50, 0.0  ;;  %v2059_v51 = vmul.f32 0.01, %v2049_v50 }
 0x19a   :  { %2779 = vmatpush.bf16.msra.mxu2 %v4593_v45 }
 0x19b   :  { %v2063_v37 = vsel %vm2055_vm3, %v2049_v50, %v2059_v51 }
 0x19c   :  { %v2067_v52 = vpack.c.bf16 %v2063_v37, %v2063_v37  ;;  %v2037_v53 = vpop.f32.mrf.mxu2 }
 0x19d   :  { %v2050_v54 = vpop.f32.mrf.mxu3 }
 0x19e   :  { %2505 = vmatmul.bf16.vlgmr.msra.gmra.mxu3 %v2067_v52 }
 0x19f   :  { %2819 = vmatpush.bf16.msra.mxu3 %v4598_v4 }
 0x1a3   :  { %2820 = vmatpush.bf16.msra.mxu3 %v4597_v55 }
 0x1ac   :  { %v2467_v57 = vpop.f32.mrf.mxu0 }
 0x1ad   :  { %v2468_v58 = vadd.f32 %v2467_v57, %v2134_v43  ;;  %v2480_v60 = vpop.f32.mrf.mxu1  ;;  %v4606_v43 = vld [vmem:[%s4955_s9] ss:$0 sm:$0xff] }
 0x1ae   :  { %2557 = vmatmul.bf16.vlgmr.msrb.gmra.mxu3 %v2067_v52 }
 0x1af   :  { %v2481_v61 = vadd.f32 %v2480_v60, %v2468_v58 }
 0x1b4   :  { %v2469_v17 = vpop.f32.mrf.mxu0 }
 0x1b5   :  { %v2482_v63 = vpop.f32.mrf.mxu1 }
 0x1cc   :  { %v2519_v26 = vpop.f32.mrf.mxu0 }
 0x1cd   :  { %v2520_v1 = vadd.f32 %v2519_v26, %v2135_v0  ;;  %v2532_v2 = vpop.f32.mrf.mxu1  ;;  %v2826_v0 = vlaneseq }
 0x1cf   :  { %v2533_v24 = vadd.f32 %v2532_v2, %v2520_v1  ;;  %v2827_v26 = vand.u32 127, %v2826_v0  ;;  %v4607_v1 = vld [vmem:[%s4956_s10] ss:$0 sm:$0xff] }
 0x1d1   :  { %vm2829_vm10 = vcmp.ge.s32.totalorder %v2827_v26, 1  ;;  %vm2830_vm11 = vcmp.lt.s32.totalorder %v2827_v26, 11 }
 0x1d2   :  { %vm4933_vm12 = vmand %vm2829_vm10, %vm2830_vm11 }
 0x1d4   :  { %v2521_v12 = vpop.f32.mrf.mxu0 }
 0x1d5   :  { %v2534_v3 = vpop.f32.mrf.mxu1 }
 0x1e1   :  { %v2493_v7 = vpop.f32.mrf.mxu2 }
 0x1e2   :  { %v2494_v28 = vadd.f32 %v2493_v7, %v2481_v61 }
 0x1e9   :  { %v2495_v32 = vpop.f32.mrf.mxu2 }
 0x1f1   :  { %v2545_v11 = vpop.f32.mrf.mxu2 }
 0x1f2   :  { %v2546_v59 = vadd.f32 %v2545_v11, %v2533_v24 }
 0x1f9   :  { %v2547_v38 = vpop.f32.mrf.mxu2 }
 0x221   :  { %v2506_v30 = vpop.f32.mrf.mxu3 }
 0x222   :  { %v2507_v33 = vadd.f32 %v2506_v30, %v2494_v28 }
 0x224   :  { %vm2562_vm4 = vcmp.ge.f32.partialorder %v2507_v33, 0.0  ;;  %v2564_v34 = vmul.f32 0.01, %v2507_v33 }
 0x226   :  { %v2566_v35 = vsel %vm2562_vm4, %v2507_v33, %v2564_v34 }
 0x227   :  { %v2568_v36 = vpack.c.bf16 %v2566_v35, %v2566_v35 }
 0x229   :  { %v2508_v39 = vpop.f32.mrf.mxu3  ;;  %2710 = vmatmul.bf16.vlgmr.msra.gmra.mxu0 %v2568_v36 }
 0x231   :  { %v2558_v21 = vpop.f32.mrf.mxu3 }
 0x232   :  { %v2559_v22 = vadd.f32 %v2558_v21, %v2546_v59 }
 0x234   :  { %vm2563_vm5 = vcmp.ge.f32.partialorder %v2559_v22, 0.0  ;;  %v2565_v40 = vmul.f32 0.01, %v2559_v22 }
 0x236   :  { %v2567_v41 = vsel %vm2563_vm5, %v2559_v22, %v2565_v40  ;;  %vm2828_vm5 = vcmp.eq.s32.totalorder %v2827_v26, 0 }
 0x237   :  { %v2569_v56 = vpack.c.bf16 %v2567_v41, %v2567_v41 }
 0x239   :  { %v2560_v42 = vpop.f32.mrf.mxu3  ;;  %2723 = vmatmul.bf16.vlgmr.msra.gmra.mxu1 %v2569_v56 }
 0x2a6   :  { %v2711_v46 = vpop.f32.mrf.mxu0 }
 0x2a7   :  { %v2712_v49 = vadd.f32 %v4605_v48, %v2711_v46 }
 0x2ae   :  { %v2713_v47 = vpop.f32.mrf.mxu0 }
 0x2b6   :  { %v2724_v50 = vpop.f32.mrf.mxu1 }
 0x2b7   :  { %v2725_v51 = vadd.f32 %v2724_v50, %v2712_v49 }
 0x2b9   :  { %vm2728_vm6 = vcmp.ge.f32.partialorder %v2725_v51, 0.0  ;;  %v2729_v37 = vmul.f32 0.01, %v2725_v51 }
 0x2bb   :  { %v2730_v52 = vsel %vm2728_vm6, %v2725_v51, %v2729_v37 }
 0x2bc   :  { %v2731_v53 = vpack.c.bf16 %v2730_v52, %v2730_v52 }
 0x2be   :  { %v2726_v54 = vpop.f32.mrf.mxu1  ;;  %4247 = vmatmul.msk.bf16.vlgmr.msra.gmra.mxu2 %vm2768_vm7, %v2731_v53 }
 0x341   :  { %v2781_v57 = vpop.f32.mrf.mxu2 }
 0x342   :  { %v2782_v58 = vadd.f32 %v4606_v43, %v2781_v57 }
 0x344   :  { %vm2785_vm8 = vcmp.ge.f32.partialorder %v2782_v58, 0.0  ;;  %v2786_v60 = vmul.f32 0.01, %v2782_v58 }
 0x346   :  { %v2787_v61 = vsel %vm2785_vm8, %v2782_v58, %v2786_v60 }
 0x347   :  { %v2788_v17 = vpack.c.bf16 %v2787_v61, %v2787_v61 }
 0x349   :  { %v2783_v63 = vpop.f32.mrf.mxu2  ;;  %4256 = vmatmul.msk.bf16.vlgmr.msra.gmra.mxu3 %vm2809_vm9, %v2788_v17 }
 0x3cc   :  { %v2822_v2 = vpop.f32.mrf.mxu3 }
 0x3cd   :  { %v2823_v12 = vadd.f32 %v4607_v1, %v2822_v2 }
 0x3cf   :  { %v2851_v3 = vsel %vm4933_vm12, %v2823_v12, -1e+30  ;;  %v2832_v32 = vsub.f32 0.0, %v2823_v12 }
 0x3d0   :  { %v2853_v18 = vsel %vm2852_vm13, %v2851_v3, -inf }
 0x3d1   :  { %2854 = vmax.xlane.f32.xlu0 %v2853_v18  ;;  %v2833_v10 = vmul.f32 1.442695, %v2832_v32 }
 0x3d4   :  { %v2824_v29 = vpop.f32.mrf.mxu3 }
 0x444   :  { %v2855_v6 = vpop.xlane.xlu0 %2854 }
 0x445   :  { %v2856_v62 = vsub.f32 %v2851_v3, %v2855_v6 }
 0x447   :  { %v2857_v8 = vmul.f32 1.442695, %v2856_v62 }
 0x449   :  { %4608 = vpow2.f32 %v2857_v8 }
 0x44a   :  { %4610 = vpow2.f32 %v2833_v10 }
 0x44f   :  { %v4609_v7 = vpop.eup %4608 }
 0x450   :  { %v2859_v31 = vsel %vm4933_vm12, %v4609_v7, 0.0  ;;  %v4611_v11 = vpop.eup %4610 }
 0x451   :  { %v2860_v9 = vsel %vm2852_vm13, %v2859_v31, 0.0  ;;  %v2835_v38 = vadd.f32 1.0, %v4611_v11 }
 0x452   :  { %2861 = vadd.xlane.f32.xlu0 %v2860_v9 }
 0x453   :  { %4612 = vrcp.f32 %v2835_v38  ;;  %v2847_v35 = vand.u32 2147483648, %v2835_v38  ;;  %vm2841_vm1 = vweird.f32 %v2835_v38  ;;  %v2845_v39 = vand.u32 2147483647, %v2835_v38 }
 0x455   :  { %v2848_v41 = vor.u32 1.1754944e-38, %v2847_v35  ;;  %vm2846_vm6 = vcmp.eq.f32.partialorder %v2845_v39, 8.507059e+37 }
 0x459   :  { %v4613_v13 = vpop.eup %4612 }
 0x45a   :  { %v2837_v15 = vmul.f32 %v4613_v13, %v2835_v38  ;;  %vm2842_vm15 = vweird.f32 %v4613_v13 }
 0x45b   :  { %vm2843_vm3 = vmor %vm2841_vm1, %vm2842_vm15 }
 0x45c   :  { %v2838_v16 = vsub.f32 1.0, %v2837_v15 }
 0x45e   :  { %v2839_v25 = vmul.f32 %v4613_v13, %v2838_v16 }
 0x460   :  { %v2840_v34 = vadd.f32 %v4613_v13, %v2839_v25 }
 0x462   :  { %v2844_v22 = vsel %vm2843_vm3, %v4613_v13, %v2840_v34 }
 0x463   :  { %v2849_v42 = vsel %vm2846_vm6, %v2848_v41, %v2844_v22 }
 0x4c5   :  { %v2862_v14 = vpop.xlane.xlu0 %2861 }
 0x4c6   :  { %4614 = vrcp.f32 %v2862_v14  ;;  %v2874_v28 = vand.u32 2147483648, %v2862_v14  ;;  %v2872_v33 = vand.u32 2147483647, %v2862_v14  ;;  %vm2868_vm0 = vweird.f32 %v2862_v14 }
 0x4c8   :  { %v2875_v59 = vor.u32 1.1754944e-38, %v2874_v28  ;;  %vm2873_vm4 = vcmp.eq.f32.partialorder %v2872_v33, 8.507059e+37 }
 0x4cc   :  { %v4615_v19 = vpop.eup %4614 }
 0x4cd   :  { %v2864_v23 = vmul.f32 %v4615_v19, %v2862_v14  ;;  %vm2869_vm14 = vweird.f32 %v4615_v19 }
 0x4ce   :  { %vm2870_vm2 = vmor %vm2868_vm0, %vm2869_vm14 }
 0x4cf   :  { %v2865_v27 = vsub.f32 1.0, %v2864_v23 }
 0x4d1   :  { %v2866_v30 = vmul.f32 %v4615_v19, %v2865_v27 }
 0x4d3   :  { %v2867_v36 = vadd.f32 %v4615_v19, %v2866_v30 }
 0x4d5   :  { %v2871_v21 = vsel %vm2870_vm2, %v4615_v19, %v2867_v36 }
 0x4d6   :  { %v2876_v40 = vsel %vm2873_vm4, %v2875_v59, %v2871_v21 }
 0x4d7   :  { %v2877_v56 = vmul.f32 %v2876_v40, %v2859_v31 }
 0x4d9   :  { %v2878_v5 = vsel %vm4933_vm12, %v2877_v56, %v2823_v12 }
 0x4da   :  { %v2879_v20 = vsel %vm2828_vm5, %v2849_v42, %v2878_v5 }
 0x4db   :  { %2880 = vst [vmem:[%s4957_s11] sm:$0x3] %v2879_v20 }
 0x4dc   :  { %2885 = vsyncpa [#allocation3], 1 }
 0x4dd   :  { %2886 = vsyncpa [#allocation5], 1 }

</bundles_post_ra>
